<compile_context>
chip_gen: v5e
topology: v5e:2x2
jax: 0.10.0
libtpu: 0.0.40
codegen_flags: <defaults>
</compile_context>

<pallas_src>
import jax
import jax.numpy as jnp
from jax import lax
from jax.experimental import pallas as pl
from jax.experimental.pallas import tpu as pltpu

K = 3  # conv kernel width (same padding)


def _cnn_encoder_kernel(len_ref,            # (Bb, 1) int32 lengths for this block
                        x_ref,              # (Bb, S, H) bf16 embedded inputs
                        w1_ref, b1_ref,     # (K*H, H) bf16, (1, H) f32
                        w2_ref, b2_ref,     # (K*H, H) bf16, (1, H) f32
                        y_ref,              # (Bb, S, H) bf16 per-step outputs
                        pool_ref):          # (Bb, H) f32 pooled state
    Bb, S, H = x_ref.shape
    M = Bb * S

    # Per-sequence position + validity masks, kept in (Bb, S, 1) layout.
    seq_pos = lax.broadcasted_iota(jnp.int32, (Bb, S, 1), 1)
    lens = len_ref[...]                                   # (Bb, 1) int32
    valid = seq_pos < lens[:, :, None]                    # (Bb, S, 1) bool
    first_row = (seq_pos == 0).reshape(M, 1)       # kills roll(+1) leakage
    last_row = (seq_pos == S - 1).reshape(M, 1)    # kills roll(-1) leakage

    def conv_same(h_bf, h_f32, w_ref_, b_ref_):
        # "same" conv, kernel width K=3, taps stacked on the CONTRACTION dim:
        #   stacked = [h[t-1] | h[t] | h[t+1]]  (M, 3H) bf16, boundary rows 0
        #   out     = stacked @ [w0; w1; w2]    (M, H)  f32 accumulation
        # h_bf / h_f32 hold the same masked activations (mid tap uses the
        # bf16 copy; the +-1 row shifts roll the f32 copy then downcast).
        hm = h_bf.reshape(M, H)
        hf = h_f32.reshape(M, H)
        prev = jnp.where(first_row, 0.0, pltpu.roll(hf, shift=1, axis=0))
        nxt = jnp.where(last_row, 0.0, pltpu.roll(hf, shift=M - 1, axis=0))
        stacked = jnp.concatenate(
            [prev.astype(jnp.bfloat16), hm, nxt.astype(jnp.bfloat16)], axis=1)
        y = jnp.dot(stacked, w_ref_[...],
                    preferred_element_type=jnp.float32)          # (M, H) f32
        return y.reshape(Bb, S, H) + b_ref_[...]   # (1, H) broadcasts

    # Mask padded timesteps INSIDE the kernel (caller need not pre-mask).
    x_bf = jnp.where(valid, x_ref[...], 0)                 # (Bb, S, H) bf16
    x_f32 = x_bf.astype(jnp.float32)

    # Layer 1: conv -> ReLU -> mask padded timesteps.
    h1 = jnp.maximum(conv_same(x_bf, x_f32, w1_ref, b1_ref), 0.0)
    h1 = jnp.where(valid, h1, 0.0)                         # f32

    # Layer 2: conv -> ReLU -> residual -> mask padded timesteps.
    h2 = jnp.maximum(conv_same(h1.astype(jnp.bfloat16), h1, w2_ref, b2_ref),
                     0.0) + h1
    h2 = jnp.where(valid, h2, 0.0)

    y_ref[...] = h2.astype(y_ref.dtype)

    # Masked mean pool over valid timesteps (approx reciprocal -> EUP slot).
    denom = jnp.maximum(lens, 1).astype(jnp.float32)       # (Bb, 1)
    pool_ref[...] = (jnp.sum(h2, axis=1) *
                     pl.reciprocal(denom, approx=True)).astype(pool_ref.dtype)


def cnn_encoder_forward(emb, lengths, w1, b1, w2, b2, *, block_b=8):
    """emb: (B, S, H) float, lengths: (B,) int32, w*: (K, H, H), b*: (1, H).

    Returns (per-step features (B, S, H) bf16, pooled state (B, H) f32).
    Padded timesteps beyond `lengths` are masked inside the kernel.
    """
    B, S, H = emb.shape

    # Pad batch to a multiple of block_b (block_b kept a multiple of 8 so the
    # (block_b, 1) / (block_b, H) tiles obey the sublane rule).  With B=16
    # and block_b=8 the grid is 2, keeping both v7x TensorCores busy.
    n_blocks = pl.cdiv(B, block_b)
    B_pad = n_blocks * block_b
    if B_pad != B:
        emb = jnp.pad(emb, ((0, B_pad - B), (0, 0), (0, 0)))
        lengths = jnp.pad(lengths, (0, B_pad - B))
    lens2d = lengths.astype(jnp.int32).reshape(B_pad, 1)

    # bf16 MXU operand: cast the activations ONCE here so the kernel's HBM
    # read of the (B,S,H) slab is half-width.
    emb_bf = emb.astype(jnp.bfloat16)

    # Stack the K taps on the contraction dim -> (K*H, H), cast bf16 once.
    w1s = jnp.concatenate([w1[k] for k in range(K)], axis=0).astype(jnp.bfloat16)
    w2s = jnp.concatenate([w2[k] for k in range(K)], axis=0).astype(jnp.bfloat16)
    b1 = b1.astype(jnp.float32).reshape(1, H)
    b2 = b2.astype(jnp.float32).reshape(1, H)

    grid_spec = pltpu.PrefetchScalarGridSpec(
        num_scalar_prefetch=0,
        grid=(n_blocks,),
        in_specs=[
            pl.BlockSpec((block_b, 1), lambda g: (g, 0)),
            pl.BlockSpec((block_b, S, H), lambda g: (g, 0, 0)),
            pl.BlockSpec((K * H, H), lambda g: (0, 0)),
            pl.BlockSpec((1, H), lambda g: (0, 0)),
            pl.BlockSpec((K * H, H), lambda g: (0, 0)),
            pl.BlockSpec((1, H), lambda g: (0, 0)),
        ],
        out_specs=[
            pl.BlockSpec((block_b, S, H), lambda g: (g, 0, 0)),
            pl.BlockSpec((block_b, H), lambda g: (g, 0)),
        ],
    )

    # Advisory cost for XLA scheduling around the custom call.
    flops = 2 * 2 * B_pad * S * (K * H) * H               # 2 fused-conv layers
    bytes_accessed = (2 * B_pad * S * H) * 2 + B_pad * H * 4 \
        + (w1s.size + w2s.size) * 2 + (b1.size + b2.size) * 4 + lens2d.size * 4
    cost = pl.CostEstimate(flops=flops, transcendentals=B_pad,
                           bytes_accessed=bytes_accessed)

    y, pooled = pl.pallas_call(
        _cnn_encoder_kernel,
        grid_spec=grid_spec,
        out_shape=(
            jax.ShapeDtypeStruct((B_pad, S, H), jnp.bfloat16),
            jax.ShapeDtypeStruct((B_pad, H), jnp.float32),
        ),
        compiler_params=pltpu.CompilerParams(
            dimension_semantics=("parallel",)),
        cost_estimate=cost,
    )(lens2d, emb_bf, w1s, b1, w2s, b2)

    return y[:B], pooled[:B]


def ref_forward(emb, lengths, w1, b1, w2, b2):
    """Plain-JAX reference (same bf16 MXU operand casts, f32 accumulation)."""
    B, S, H = emb.shape
    mask = (jnp.arange(S)[None, :] < lengths[:, None])[:, :, None]
    emb = emb * mask                       # kernel masks inputs internally

    def conv(h, w, bias):
        hp = jnp.pad(h.astype(jnp.bfloat16), ((0, 0), (1, 1), (0, 0)))
        out = sum(jnp.einsum("bsh,hg->bsg", hp[:, k:k + S],
                             w[k].astype(jnp.bfloat16),
                             preferred_element_type=jnp.float32)
                  for k in range(K))
        return out + bias                                   # (1,H) broadcasts

    h1 = jnp.maximum(conv(emb, w1, b1), 0.0) * mask
    h2 = (jnp.maximum(conv(h1, w2, b2), 0.0) + h1) * mask
    pooled = h2.sum(1) / jnp.maximum(lengths, 1)[:, None].astype(jnp.float32)
    return h2, pooled


if __name__ == "__main__":
    B, S, H, VOCAB = 16, 16, 128, 50

    key = jax.random.PRNGKey(0)
    k_emb, k_ids, k_len, k_w1, k_b1, k_w2, k_b2 = jax.random.split(key, 7)

    # Deterministic synthetic parameters (shapes implied by a 2-layer k=3 CNN
    # encoder with hidden size H and tied embed dim).
    embed_table = jax.random.normal(k_emb, (VOCAB, H), jnp.float32) * 0.1
    w1 = jax.random.normal(k_w1, (K, H, H), jnp.float32) * (1.0 / H) ** 0.5
    b1 = jax.random.normal(k_b1, (1, H), jnp.float32) * 0.01
    w2 = jax.random.normal(k_w2, (K, H, H), jnp.float32) * (1.0 / H) ** 0.5
    b2 = jax.random.normal(k_b2, (1, H), jnp.float32) * 0.01

    ids = jax.random.randint(k_ids, (B, S), 0, VOCAB, jnp.int32)
    lengths = jax.random.randint(k_len, (B,), 1, S + 1, jnp.int32)
    lengths = lengths.at[0].set(S)    # ensure at least one full-length sequence

    # Glue: embedding lookup only; padded-timestep masking now happens inside
    # the kernel (no external emb * mask pass).
    emb = embed_table[ids]                                      # (B, S, H) f32

    y, pooled = cnn_encoder_forward(emb, lengths, w1, b1, w2, b2, block_b=8)
    jax.block_until_ready((y, pooled))

    y_ref, pooled_ref = ref_forward(emb, lengths, w1, b1, w2, b2)
    assert jnp.allclose(y.astype(jnp.float32), y_ref,
                        atol=2e-2, rtol=2e-2), "outputs mismatch"
    assert jnp.allclose(pooled, pooled_ref,
                        atol=2e-2, rtol=2e-2), "pool mismatch"

    print("KERNEL_OK")
</pallas_src>

<mosaic_0001>
module attributes {stable_mosaic.version = 11 : i64} {
  func.func @_cnn_encoder_kernel(%arg0: i32, %arg1: memref<8x1xi32, #tpu.memory_space<vmem>>, %arg2: memref<8x16x128xbf16, #tpu.memory_space<vmem>>, %arg3: memref<384x128xbf16, #tpu.memory_space<vmem>>, %arg4: memref<1x128xf32, #tpu.memory_space<vmem>>, %arg5: memref<384x128xbf16, #tpu.memory_space<vmem>>, %arg6: memref<1x128xf32, #tpu.memory_space<vmem>>, %arg7: memref<8x16x128xbf16, #tpu.memory_space<vmem>>, %arg8: memref<8x128xf32, #tpu.memory_space<vmem>>) attributes {dimension_semantics = [#tpu.dimension_semantics<parallel>], iteration_bounds = array<i64: 2>, scalar_prefetch = 0 : i64, scratch_operands = 0 : i64, tpu.core_type = #tpu.core_type<tc>, window_params = [{transform_indices = @transform_0, window_bounds = array<i64: 8, 1>}, {transform_indices = @transform_1, window_bounds = array<i64: 8, 16, 128>}, {pipeline_mode = #tpu.pipeline_mode<synchronous>, transform_indices = @transform_2, window_bounds = array<i64: 384, 128>}, {pipeline_mode = #tpu.pipeline_mode<synchronous>, transform_indices = @transform_3, window_bounds = array<i64: 1, 128>}, {pipeline_mode = #tpu.pipeline_mode<synchronous>, transform_indices = @transform_4, window_bounds = array<i64: 384, 128>}, {pipeline_mode = #tpu.pipeline_mode<synchronous>, transform_indices = @transform_5, window_bounds = array<i64: 1, 128>}, {transform_indices = @transform_6, window_bounds = array<i64: 8, 16, 128>}, {transform_indices = @transform_7, window_bounds = array<i64: 8, 128>}]} {
    %0 = tpu.iota {dimensions = array<i32: 1>} : vector<8x16x1xi32>
    %c0 = arith.constant 0 : index
    %c0_0 = arith.constant 0 : index
    %1 = vector.load %arg1[%c0, %c0_0] : memref<8x1xi32, #tpu.memory_space<vmem>>, vector<8x1xi32>
    %2 = vector.shape_cast %1 : vector<8x1xi32> to vector<8x1x1xi32>
    %3 = vector.broadcast %2 : vector<8x1x1xi32> to vector<8x16x1xi32>
    %4 = arith.cmpi slt, %0, %3 : vector<8x16x1xi32>
    %c0_i32 = arith.constant 0 : i32
    %5 = vector.broadcast %c0_i32 : i32 to vector<8x16x1xi32>
    %6 = arith.cmpi eq, %0, %5 : vector<8x16x1xi32>
    %7 = vector.shape_cast %6 : vector<8x16x1xi1> to vector<128x1xi1>
    %c15_i32 = arith.constant 15 : i32
    %8 = vector.broadcast %c15_i32 : i32 to vector<8x16x1xi32>
    %9 = arith.cmpi eq, %0, %8 : vector<8x16x1xi32>
    %10 = vector.shape_cast %9 : vector<8x16x1xi1> to vector<128x1xi1>
    %c0_1 = arith.constant 0 : index
    %c0_2 = arith.constant 0 : index
    %c0_3 = arith.constant 0 : index
    %11 = vector.load %arg2[%c0_1, %c0_2, %c0_3] : memref<8x16x128xbf16, #tpu.memory_space<vmem>>, vector<8x16x128xbf16>
    %c0_i32_4 = arith.constant 0 : i32
    %12 = arith.sitofp %c0_i32_4 : i32 to bf16
    %13 = vector.shape_cast %4 : vector<8x16x1xi1> to vector<8x16x1xi1>
    %14 = vector.broadcast %13 : vector<8x16x1xi1> to vector<8x16x128xi1>
    %15 = vector.broadcast %12 : bf16 to vector<8x16x128xbf16>
    %16 = arith.select %14, %11, %15 : vector<8x16x128xi1>, vector<8x16x128xbf16>
    %17 = arith.extf %16 : vector<8x16x128xbf16> to vector<8x16x128xf32>
    %18 = vector.shape_cast %16 : vector<8x16x128xbf16> to vector<128x128xbf16>
    %19 = vector.shape_cast %17 : vector<8x16x128xf32> to vector<128x128xf32>
    %c1_i32 = arith.constant 1 : i32
    %20 = tpu.dynamic_rotate %19 by %c1_i32 dim 0 : vector<128x128xf32>, i32 -> vector<128x128xf32>
    %cst = arith.constant 0.000000e+00 : f32
    %21 = vector.shape_cast %7 : vector<128x1xi1> to vector<128x1xi1>
    %22 = vector.broadcast %21 : vector<128x1xi1> to vector<128x128xi1>
    %23 = vector.broadcast %cst : f32 to vector<128x128xf32>
    %24 = arith.select %22, %23, %20 : vector<128x128xi1>, vector<128x128xf32>
    %c127_i32 = arith.constant 127 : i32
    %25 = tpu.dynamic_rotate %19 by %c127_i32 dim 0 : vector<128x128xf32>, i32 -> vector<128x128xf32>
    %cst_5 = arith.constant 0.000000e+00 : f32
    %26 = vector.shape_cast %10 : vector<128x1xi1> to vector<128x1xi1>
    %27 = vector.broadcast %26 : vector<128x1xi1> to vector<128x128xi1>
    %28 = vector.broadcast %cst_5 : f32 to vector<128x128xf32>
    %29 = arith.select %27, %28, %25 : vector<128x128xi1>, vector<128x128xf32>
    %30 = arith.truncf %24 : vector<128x128xf32> to vector<128x128xbf16>
    %31 = arith.truncf %29 : vector<128x128xf32> to vector<128x128xbf16>
    %32 = tpu.concatenate %30, %18, %31 in 1 : vector<128x128xbf16>, vector<128x128xbf16>, vector<128x128xbf16> -> vector<128x384xbf16>
    %c0_6 = arith.constant 0 : index
    %c0_7 = arith.constant 0 : index
    %33 = vector.load %arg3[%c0_6, %c0_7] : memref<384x128xbf16, #tpu.memory_space<vmem>>, vector<384x128xbf16>
    %cst_8 = arith.constant dense<0.000000e+00> : vector<128x128xf32>
    %34 = tpu.matmul %32, %33, %cst_8 {dimension_numbers = #tpu.dot_dimension_numbers<[1], [0], [0], [1], [0, 0, 1, 1], [], []>} : vector<128x384xbf16>, vector<384x128xbf16>, vector<128x128xf32> -> vector<128x128xf32>
    %35 = vector.shape_cast %34 : vector<128x128xf32> to vector<8x16x128xf32>
    %c0_9 = arith.constant 0 : index
    %c0_10 = arith.constant 0 : index
    %36 = vector.load %arg4[%c0_9, %c0_10] : memref<1x128xf32, #tpu.memory_space<vmem>>, vector<1x128xf32>
    %37 = vector.shape_cast %36 : vector<1x128xf32> to vector<1x1x128xf32>
    %38 = vector.broadcast %37 : vector<1x1x128xf32> to vector<8x16x128xf32>
    %39 = arith.addf %35, %38 : vector<8x16x128xf32>
    %cst_11 = arith.constant 0.000000e+00 : f32
    %40 = vector.broadcast %cst_11 : f32 to vector<8x16x128xf32>
    %41 = arith.maximumf %39, %40 : vector<8x16x128xf32>
    %cst_12 = arith.constant 0.000000e+00 : f32
    %42 = vector.shape_cast %4 : vector<8x16x1xi1> to vector<8x16x1xi1>
    %43 = vector.broadcast %42 : vector<8x16x1xi1> to vector<8x16x128xi1>
    %44 = vector.broadcast %cst_12 : f32 to vector<8x16x128xf32>
    %45 = arith.select %43, %41, %44 : vector<8x16x128xi1>, vector<8x16x128xf32>
    %46 = arith.truncf %45 : vector<8x16x128xf32> to vector<8x16x128xbf16>
    %47 = vector.shape_cast %46 : vector<8x16x128xbf16> to vector<128x128xbf16>
    %48 = vector.shape_cast %45 : vector<8x16x128xf32> to vector<128x128xf32>
    %c1_i32_13 = arith.constant 1 : i32
    %49 = tpu.dynamic_rotate %48 by %c1_i32_13 dim 0 : vector<128x128xf32>, i32 -> vector<128x128xf32>
    %cst_14 = arith.constant 0.000000e+00 : f32
    %50 = vector.shape_cast %7 : vector<128x1xi1> to vector<128x1xi1>
    %51 = vector.broadcast %50 : vector<128x1xi1> to vector<128x128xi1>
    %52 = vector.broadcast %cst_14 : f32 to vector<128x128xf32>
    %53 = arith.select %51, %52, %49 : vector<128x128xi1>, vector<128x128xf32>
    %c127_i32_15 = arith.constant 127 : i32
    %54 = tpu.dynamic_rotate %48 by %c127_i32_15 dim 0 : vector<128x128xf32>, i32 -> vector<128x128xf32>
    %cst_16 = arith.constant 0.000000e+00 : f32
    %55 = vector.shape_cast %10 : vector<128x1xi1> to vector<128x1xi1>
    %56 = vector.broadcast %55 : vector<128x1xi1> to vector<128x128xi1>
    %57 = vector.broadcast %cst_16 : f32 to vector<128x128xf32>
    %58 = arith.select %56, %57, %54 : vector<128x128xi1>, vector<128x128xf32>
    %59 = arith.truncf %53 : vector<128x128xf32> to vector<128x128xbf16>
    %60 = arith.truncf %58 : vector<128x128xf32> to vector<128x128xbf16>
    %61 = tpu.concatenate %59, %47, %60 in 1 : vector<128x128xbf16>, vector<128x128xbf16>, vector<128x128xbf16> -> vector<128x384xbf16>
    %c0_17 = arith.constant 0 : index
    %c0_18 = arith.constant 0 : index
    %62 = vector.load %arg5[%c0_17, %c0_18] : memref<384x128xbf16, #tpu.memory_space<vmem>>, vector<384x128xbf16>
    %cst_19 = arith.constant dense<0.000000e+00> : vector<128x128xf32>
    %63 = tpu.matmul %61, %62, %cst_19 {dimension_numbers = #tpu.dot_dimension_numbers<[1], [0], [0], [1], [0, 0, 1, 1], [], []>} : vector<128x384xbf16>, vector<384x128xbf16>, vector<128x128xf32> -> vector<128x128xf32>
    %64 = vector.shape_cast %63 : vector<128x128xf32> to vector<8x16x128xf32>
    %c0_20 = arith.constant 0 : index
    %c0_21 = arith.constant 0 : index
    %65 = vector.load %arg6[%c0_20, %c0_21] : memref<1x128xf32, #tpu.memory_space<vmem>>, vector<1x128xf32>
    %66 = vector.shape_cast %65 : vector<1x128xf32> to vector<1x1x128xf32>
    %67 = vector.broadcast %66 : vector<1x1x128xf32> to vector<8x16x128xf32>
    %68 = arith.addf %64, %67 : vector<8x16x128xf32>
    %cst_22 = arith.constant 0.000000e+00 : f32
    %69 = vector.broadcast %cst_22 : f32 to vector<8x16x128xf32>
    %70 = arith.maximumf %68, %69 : vector<8x16x128xf32>
    %71 = arith.addf %70, %45 : vector<8x16x128xf32>
    %cst_23 = arith.constant 0.000000e+00 : f32
    %72 = vector.shape_cast %4 : vector<8x16x1xi1> to vector<8x16x1xi1>
    %73 = vector.broadcast %72 : vector<8x16x1xi1> to vector<8x16x128xi1>
    %74 = vector.broadcast %cst_23 : f32 to vector<8x16x128xf32>
    %75 = arith.select %73, %71, %74 : vector<8x16x128xi1>, vector<8x16x128xf32>
    %76 = arith.truncf %75 : vector<8x16x128xf32> to vector<8x16x128xbf16>
    %c0_24 = arith.constant 0 : index
    %c0_25 = arith.constant 0 : index
    %c0_26 = arith.constant 0 : index
    %77 = vector.load %arg7[%c0_24, %c0_25, %c0_26] : memref<8x16x128xbf16, #tpu.memory_space<vmem>>, vector<8x16x128xbf16>
    tpu.vector_store %arg7[%c0_24, %c0_25, %c0_26], %76 {strides = array<i32>} : memref<8x16x128xbf16, #tpu.memory_space<vmem>>, vector<8x16x128xbf16>,
    %c1_i32_27 = arith.constant 1 : i32
    %78 = vector.broadcast %c1_i32_27 : i32 to vector<8x1xi32>
    %79 = arith.maxsi %1, %78 : vector<8x1xi32>
    %80 = arith.sitofp %79 : vector<8x1xi32> to vector<8x1xf32>
    %cst_28 = arith.constant dense<0.000000e+00> : vector<8x128xf32>
    %81 = vector.multi_reduction <add>, %75, %cst_28 [1] : vector<8x16x128xf32> to vector<8x128xf32>
    %82 = tpu.reciprocal %80 {approx = true} : vector<8x1xf32> -> vector<8x1xf32>
    %83 = vector.broadcast %82 : vector<8x1xf32> to vector<8x128xf32>
    %84 = arith.mulf %81, %83 : vector<8x128xf32>
    %c0_29 = arith.constant 0 : index
    %c0_30 = arith.constant 0 : index
    %85 = vector.load %arg8[%c0_29, %c0_30] : memref<8x128xf32, #tpu.memory_space<vmem>>, vector<8x128xf32>
    tpu.vector_store %arg8[%c0_29, %c0_30], %84 {strides = array<i32>} : memref<8x128xf32, #tpu.memory_space<vmem>>, vector<8x128xf32>,
    return
  }
  func.func @transform_0(%arg0: i32) -> (i32, i32) {
    %c0_i32 = arith.constant 0 : i32
    %c0_i32_0 = arith.constant 0 : i32
    return %arg0, %c0_i32 : i32, i32
  }
  func.func @transform_1(%arg0: i32) -> (i32, i32, i32) {
    %c0_i32 = arith.constant 0 : i32
    %c0_i32_0 = arith.constant 0 : i32
    %c0_i32_1 = arith.constant 0 : i32
    return %arg0, %c0_i32, %c0_i32_0 : i32, i32, i32
  }
  func.func @transform_2(%arg0: i32) -> (i32, i32) {
    %c0_i32 = arith.constant 0 : i32
    %c0_i32_0 = arith.constant 0 : i32
    %c0_i32_1 = arith.constant 0 : i32
    return %c0_i32, %c0_i32_0 : i32, i32
  }
  func.func @transform_3(%arg0: i32) -> (i32, i32) {
    %c0_i32 = arith.constant 0 : i32
    %c0_i32_0 = arith.constant 0 : i32
    %c0_i32_1 = arith.constant 0 : i32
    return %c0_i32, %c0_i32_0 : i32, i32
  }
  func.func @transform_4(%arg0: i32) -> (i32, i32) {
    %c0_i32 = arith.constant 0 : i32
    %c0_i32_0 = arith.constant 0 : i32
    %c0_i32_1 = arith.constant 0 : i32
    return %c0_i32, %c0_i32_0 : i32, i32
  }
  func.func @transform_5(%arg0: i32) -> (i32, i32) {
    %c0_i32 = arith.constant 0 : i32
    %c0_i32_0 = arith.constant 0 : i32
    %c0_i32_1 = arith.constant 0 : i32
    return %c0_i32, %c0_i32_0 : i32, i32
  }
  func.func @transform_6(%arg0: i32) -> (i32, i32, i32) {
    %c0_i32 = arith.constant 0 : i32
    %c0_i32_0 = arith.constant 0 : i32
    %c0_i32_1 = arith.constant 0 : i32
    return %arg0, %c0_i32, %c0_i32_0 : i32, i32, i32
  }
  func.func @transform_7(%arg0: i32) -> (i32, i32) {
    %c0_i32 = arith.constant 0 : i32
    %c0_i32_0 = arith.constant 0 : i32
    return %arg0, %c0_i32 : i32, i32
  }
}

</mosaic_0001>

<bundles_post_ra>
// kernel: tpu_custom_call.1
= control target key start
LH: loop header
LB: loop body
LE: loop exit
PB: predicated region body
PF: predicated region fallthrough
CT: control target
= control target key end

     0   :  { %s3911_s0 = inlined_call_operand.vmem [shape: s32[16,1], index: 0, kind: input, shape index: {}]   ;;  %s3912_s1 = inlined_call_operand.hbm [shape: bf16[16,16,128], index: 1, kind: input, shape index: {}]   ;;  %s3913_s2 = inlined_call_operand.hbm [shape: bf16[384,128], index: 2, kind: input, shape index: {}]   ;;  %s3914_s3 = inlined_call_operand.vmem [shape: f32[1,128], index: 3, kind: input, shape index: {}]   ;;  %s3915_s4 = inlined_call_operand.hbm [shape: bf16[384,128], index: 4, kind: input, shape index: {}]   ;;  %s3916_s5 = inlined_call_operand.vmem [shape: f32[1,128], index: 5, kind: input, shape index: {}]   ;;  %s3917_s6 = inlined_call_operand.hbm [shape: bf16[16,16,128], index: 6, kind: output, shape index: {0}]   ;;  %s3918_s7 = inlined_call_operand.hbm [shape: f32[16,128], index: 7, kind: output, shape index: {1}]  }
   0x1   :  { %3934 = sst [smem:[#allocation15_spill]] %s3913_s2 }
   0x2   :  { %13 = vsyncpa [#allocation3], 0 }
   0x3   :  { %15 = vsyncpa [#allocation3 + $0x1], 0 }
   0x4   :  { %16 = vsyncpa [#allocation6], 0 }
   0x5   :  { %17 = vsyncpa [#allocation4], 0 }
   0x6   :  { %19 = vsyncpa [#allocation4 + $0x1], 0 }
   0x7   :  { %20 = vsyncpa [#allocation10], 0 }
   0x8   :  { %22 = vsyncpa [#allocation10 + $0x1], 0  ;;  %s2894_s24 = smov 0   ;;  %s2896_s25 = smov 0  }
   0x9   :  { %s2898_s26 = smov 0   ;;  %s2900_s27 = smov 0  }
   0xa LB: > { %s2915_s28 = sadd.s32 4294967295, %s2845_s27   ;;  %s2238_s29 = sadd.s32 4294967294, %s2845_s27   ;;  %s2845_s27 = sphi %s2900_s27, %s3973_s27   ;;  %s2841_s26 = sphi %s2898_s26, %s3972_s26   ;;  %s2837_s25 = sphi %s2896_s25, %s3971_s25   ;;  %s2833_s24 = sphi %s2894_s24, %s3970_s24  }
   0xb   : > { %p74_p0 = scmp.ne.s32.totalorder %s2837_s25, %s2833_s24  ;;  %p75_p1 = scmp.eq.s32.totalorder %s2915_s28, 0 }
   0xc   : > { %p182_p2 = scmp.eq.s32.totalorder %s2915_s28, 1  ;;  %p188_p3 = scmp.eq.s32.totalorder %s2238_s29, 1 }
   0xd   : > { %p2924_p4 = por %p75_p1, %p74_p0  ;;  %p2239_p5 = scmp.ge.s32.totalorder %s2845_s27, 1 }
   0xe   : > { %p2929_p6 = por %p188_p3, %p74_p0  ;;  %p221_p7 = scmp.lt.s32.totalorder %s2845_s27, 3 }
   0xf   : > { %s3937_s2 = sld [smem:[#allocation15_spill]]  ;;  %s2847_s13 = smov [#allocation5]  }
  0x10   : > { %p2937_p8 = pnand %p2239_p5, %p221_p7  ;;  %s234_s14 = sshll.u32 %s2847_s13, 4  ;;  %s235_s14 = int_to_ptr.vmem [resolvable:$true] %s234_s14 }
  0x11   : > { %s249_s17 = sshll.u32 %s3915_s4, 4  ;;  %s3919_s18 = smov 64   ;;  %s250_s17 = int_to_ptr.hbm [resolvable:$true] %s249_s17 }
  0x12   : > { %p2583_p9 = pneg %p2937_p8  ;;  %s3920_s19 = smov 4  }
  0x13   : > { %s2850_s20 = smov [#allocation7]   ;;  %s2956_s22 = sadd.s32 1, %s2845_s27  }
  0x14   : > { %p2584_p10 = pnand %p2583_p9, %p75_p1  ;;  %s251_s21 = sshll.u32 %s2850_s20, 4  ;;  %s252_s21 = int_to_ptr.vmem [resolvable:$true] %s251_s21 }
  0x15   : > { %s232_s11 = sshll.u32 %s3937_s2, 4  ;;  %s61_s23 = sadd.s32 1, %s2841_s26  ;;  %s233_s11 = int_to_ptr.hbm [resolvable:$true] %s232_s11 }
  0x16   : > { %2586 = dma.hbm_to_vmem [thread:$0]  (!%p2584_p10), %s233_s11, 3072, %s235_s14, [#allocation6], %s3919_s18, %s3919_s18, %s3920_s19  }
  0x17   : > { %2589 = dma.hbm_to_vmem [thread:$0]  (!%p2584_p10), %s250_s17, 3072, %s252_s21, [#allocation6], %s3919_s18, %s3919_s18, %s3920_s19  }
  0x18   : > { %s58_s29 = ssub.s32 %s2845_s27, %s2956_s22  ;;  %p68_p12 = scmp.ne.s32.totalorder %s2841_s26, %s2837_s25 }
  0x19   : > { %p59_p13 = scmp.eq.s32.totalorder %s58_s29, 0  ;;  %p69_p0 = scmp.eq.s32.totalorder %s2845_s27, 0 }
  0x1a   : > { %p2966_p3 = por %p182_p2, %p68_p12  ;;  %p2603_p5 = scmp.lt.s32.totalorder %s2845_s27, 2 }
  0x1b   : > { %s2972_s10 = scalar_select %p59_p13, %s2841_s26, %s61_s23  }
  0x1c   : > { %p70_p7 = por %p69_p0, %p68_p12  ;;  %s275_s11 = sand.u32 1, %s2841_s26  }
  0x1d   : > { %s2243_s13 = sshll.u32 %s275_s11, 6  ;;  %s2455_s14 = sshll.u32 %s2845_s27, 6 }
  0x1e   : > { %s285_s17 = scalar_lea.hbm %s3912_s1, %s2455_s14  ;;  %s279_s20 = scalar_lea.vmem [#allocation2], %s2243_s13 }
  0x1f   : > { %s288_s21 = sshll.u32 %s279_s20, 4  ;;  %s286_s29 = sshll.u32 %s285_s17, 4  ;;  %s289_s21 = int_to_ptr.vmem [resolvable:$true] %s288_s21  ;;  %s287_s29 = int_to_ptr.hbm [resolvable:$true] %s286_s29 }
  0x20   : > { %p2979_p2 = pnand %p2603_p5, %p70_p7  ;;  %s276_s23 = scalar_lea.sflag [#allocation3], %s275_s11 }
  0x21   : > { %s2713_s19 = sshra.s32 %s287_s29, 4  ;;  %s2720_s15 = scalar_lea.hbm %s3912_s1, 128  ;;  %s2714_s19 = int_to_ptr.hbm [resolvable:$true] %s2713_s19 }
  0x22   : > { %s2715_s2 = scalar_lea.hbm %s2714_s19, 64  ;;  %p2717_p10 = pneg %p2979_p2 }
  0x23   : > { %p2716_p9 = scmp.ne.s32.totalorder %s2714_s19, %s2715_s2  ;;  %p2721_p0 = scmp.lt.s32.totalorder %s2714_s19, %s3912_s1 }
  0x24   : > { %p2722_p5 = scmp.lt.s32.totalorder %s2720_s15, %s2715_s2 }
  0x25   : > { %p2718_p12 = pnand %p2717_p10, %p2716_p9 }
  0x26   : > { %p2723_p7 = por %p2722_p5, %p2721_p0 }
  0x27   : > { %p2719_p13 = pneg %p2718_p12 }
  0x29   : > { %p2724_p11 = pnand %p2723_p7, %p2719_p13 }
  0x2b   : > { %2727 = shalt.err (!%p2724_p11)
}
  0x2c   : > { %s3941_s11 = smov 4   ;;  %s3942_s20 = smov 64  }
  0x2d   : > { %2593 = dma.hbm_to_vmem [thread:$0]  (!%p2979_p2), %s287_s29, 1024, %s289_s21, %s276_s23, %s3942_s20, %s3942_s20, %s3941_s11  }
  0x2e   : > { %300 = sbr.rel (%p2937_p8) target bundleno = 824 (0x338), region = 44  ;;  %s2999_s14 = sand.u32 (!%p2937_p8), 1, %s2837_s25  }
  0x2f   : > { %s2248_s2 = sshll.u32 (!%p2937_p8), %s2999_s14, 6  ;;  %s303_s19 = scalar_lea.sflag (!%p2937_p8), [#allocation3], %s2999_s14 }
  0x30   : > { %s3005_s13 = scalar_lea.vmem (!%p2937_p8), [#allocation2], %s2248_s2 }
  0x33   : > { %2816 = dma.done.wait (%p2924_p4), %s303_s19, 1024  }
  0x34   : > { %2818 = vsyncadd (%p2924_p4), %s303_s19, 4294966272 }
  0x35   : > { %2820 = dma.done.wait (%p75_p1), [#allocation6], 6144  }
  0x36   : > { %2822 = vsyncadd (%p75_p1), [#allocation6], 4294961152  ;;  %p357_p8 = scmp.lt.s32.totalorder %s2915_s28, 1  ;;  %v364_v0 = vlaneseq  ;;  %v2851_v1 = vmov 0   ;;  %v2471_v21 = vld [vmem:[#allocation5 + $0x78] sm:$0xff]  ;;  %v2470_v23 = vld [vmem:[#allocation5 + $0x70] sm:$0xff] }
  0x37   : > { %2647 = vset.pattern.permute.xlu1 %v2851_v1  ;;  %2646 = vset.pattern.permute.xlu0 %v2851_v1  ;;  %v2463_v41 = vld [vmem:[#allocation5 + $0x38] sm:$0xff]  ;;  %v2469_v42 = vld [vmem:[#allocation5 + $0x68] sm:$0xff]  ;;  %v2462_v43 = vld [vmem:[#allocation5 + $0x30] sm:$0xff]  ;;  %s3779_s11 = scalar_lea.vmem [#allocation8], %s2248_s2  ;;  %s2505_s20 = sshll.u32 %s2915_s28, 6 }
  0x38   : > { %s358_s12 = scalar_select %p357_p8, %s2915_s28, 1  ;;  %2648 = vset.pattern.permute.xlu2 %v2851_v1  ;;  %v3020_v2 = vshrl.u32 %v364_v0, 7  ;;  %2561 = vmatpush.bf16.msra.mxu3 %v2471_v21  ;;  %v2468_v44 = vld [vmem:[#allocation5 + $0x60] sm:$0xff]  ;;  %v2461_v45 = vld [vmem:[#allocation5 + $0x28] sm:$0xff]  ;;  %v2467_v46 = vld [vmem:[#allocation5 + $0x58] sm:$0xff] }
  0x39   : > { %1070 = vmatpush.bf16.msra.mxu1 %v2471_v21  ;;  %2553 = vmatpush.bf16.msra.mxu2 %v2463_v41  ;;  %v2460_v47 = vld [vmem:[#allocation5 + $0x20] sm:$0xff]  ;;  %v2466_v48 = vld [vmem:[#allocation5 + $0x50] sm:$0xff]  ;;  %v2459_v49 = vld [vmem:[#allocation5 + $0x18] sm:$0xff]  ;;  %s2066_s18 = scalar_lea.sflag [#allocation4], %s2999_s14  ;;  %s2763_s16 = scalar_lea.hbm %s3917_s6, 128 }
  0x3a   : > { %s2253_s30 = sshll.u32 %s358_s12, 3  ;;  %v3026_v4 = vadd.s32 8, %v3020_v2  ;;  %1021 = vmatpush.bf16.msra.mxu0 %v2463_v41  ;;  %v2465_v50 = vld [vmem:[#allocation5 + $0x48] sm:$0xff]  ;;  %v2458_v52 = vld [vmem:[#allocation5 + $0x10] sm:$0xff]  ;;  %v2464_v53 = vld [vmem:[#allocation5 + $0x40] sm:$0xff]  ;;  %s2084_s12 = sshll.u32 %s3779_s11, 4  ;;  %s3856_s12 = int_to_ptr.vmem [resolvable:$true] %s2084_s12 }
  0x3b   : > { %s360_s29 = scalar_lea.vmem %s3911_s0, %s2253_s30  ;;  %v2457_v54 = vld [vmem:[#allocation5 + $0x8] sm:$0xff]  ;;  %v2456_v56 = vld [vmem:[#allocation5] sm:$0xff]  ;;  %v2479_v57 = vld [vmem:[#allocation5 + $0xb8] sm:$0xff] }
  0x3c   : > { %v367_v3 = vld [vmem:[%s360_s29] sm:$0xff]  ;;  %2562 = vmatpush.bf16.msra.mxu3 %v2470_v23  ;;  %v414_v59 = vld [vmem:[%s3005_s13 + $0x2c] sm:$0xf]  ;;  %v415_v60 = vld [vmem:[%s3005_s13 + $0x30] sm:$0xf] }
  0x3d   : > { %v371_v5 = vrot.slane %v367_v3, 4  ;;  %v370_v6 = vrot.slane %v367_v3, 3  ;;  %v372_v7 = vrot.slane %v367_v3, 5  ;;  %v373_v11 = vrot.slane %v367_v3, 6  ;;  %1071 = vmatpush.bf16.msra.mxu1 %v2470_v23  ;;  %2554 = vmatpush.bf16.msra.mxu2 %v2462_v43  ;;  %v2478_v0 = vld [vmem:[#allocation5 + $0xb0] sm:$0xff] }
  0x3e   : > { %v374_v15 = vrot.slane %v367_v3, 7  ;;  %v368_v22 = vrot.slane %v367_v3, 1  ;;  %v375_v26 = vperm.slane %v367_v3, 0  ;;  %v369_v29 = vrot.slane %v367_v3, 2  ;;  %1022 = vmatpush.bf16.msra.mxu0 %v2462_v43 }
  0x3f   : > { %v379_v8 = vperm.slane %v371_v5, 0  ;;  %v3028_v9 = vperm.slane %v370_v6, 0  ;;  %v380_v10 = vperm.slane %v372_v7, 0  ;;  %v381_v16 = vperm.slane %v373_v11, 0 }
  0x40   : > { %v382_v19 = vperm.slane %v374_v15, 0  ;;  %v376_v27 = vperm.slane %v368_v22, 0  ;;  %vm384_vm9 = vcmp.lt.s32.totalorder %v3026_v4, %v375_v26  ;;  %vm383_vm11 = vcmp.lt.s32.totalorder %v3020_v2, %v375_v26  ;;  %2563 = vmatpush.bf16.msra.mxu3 %v2469_v42  ;;  %v413_v22 = vld [vmem:[%s3005_s13 + $0x28] sm:$0xf] }
  0x41   : > { %vm392_vm0 = vcmp.lt.s32.totalorder %v3026_v4, %v379_v8  ;;  %vm390_vm1 = vcmp.lt.s32.totalorder %v3026_v4, %v3028_v9  ;;  %vm394_vm2 = vcmp.lt.s32.totalorder %v3026_v4, %v380_v10  ;;  %vm393_vm3 = vcmp.lt.s32.totalorder %v3020_v2, %v380_v10  ;;  %1072 = vmatpush.bf16.msra.mxu1 %v2469_v42  ;;  %v2476_v42 = vld [vmem:[#allocation5 + $0xa0] sm:$0xff] }
  0x42   : > { %v428_v12 = vsel %vm392_vm0, 1, %v2851_v1  ;;  %v426_v13 = vsel %vm390_vm1, 1, %v2851_v1  ;;  %v430_v14 = vsel %vm394_vm2, 1, %v2851_v1  ;;  %vm391_vm4 = vcmp.lt.s32.totalorder %v3020_v2, %v379_v8  ;;  %2555 = vmatpush.bf16.msra.mxu2 %v2461_v45  ;;  %1023 = vmatpush.bf16.msra.mxu0 %v2461_v45  ;;  %v410_v8 = vld [vmem:[%s3005_s13 + $0x1c] sm:$0xf] }
  0x43   : > { %463 = vperm.xlu1 %2647, %v428_v12   ;;  %457 = vperm.xlu0 %2646, %v426_v13   ;;  %vm395_vm5 = vcmp.lt.s32.totalorder %v3020_v2, %v381_v16  ;;  %v429_v17 = vsel %vm393_vm3, 1, %v2851_v1  ;;  %v427_v18 = vsel %vm391_vm4, 1, %v2851_v1  ;;  %vm397_vm6 = vcmp.lt.s32.totalorder %v3020_v2, %v382_v19  ;;  %v418_v12 = vld [vmem:[%s3005_s13 + $0x3c] sm:$0xf] }
  0x44   : > { %469 = vperm.xlu2 %2648, %v430_v14   ;;  %v431_v20 = vsel %vm395_vm5, 1, %v2851_v1  ;;  %vm396_vm7 = vcmp.lt.s32.totalorder %v3026_v4, %v381_v16  ;;  %vm398_vm8 = vcmp.lt.s32.totalorder %v3026_v4, %v382_v19  ;;  %v433_v24 = vsel %vm397_vm6, 1, %v2851_v1  ;;  %2564 = vmatpush.bf16.msra.mxu3 %v2468_v44  ;;  %v411_v14 = vld [vmem:[%s3005_s13 + $0x20] sm:$0xf]  ;;  %v2477_v19 = vld [vmem:[#allocation5 + $0xa8] sm:$0xff] }
  0x45   : > { %v432_v25 = vsel %vm396_vm7, 1, %v2851_v1  ;;  %v434_v28 = vsel %vm398_vm8, 1, %v2851_v1  ;;  %vm385_vm10 = vcmp.lt.s32.totalorder %v3020_v2, %v376_v27  ;;  %v420_v30 = vsel %vm384_vm9, 1, %v2851_v1  ;;  %1073 = vmatpush.bf16.msra.mxu1 %v2468_v44 }
  0x46   : > { %v421_v31 = vsel %vm385_vm10, 1, %v2851_v1  ;;  %vm1947_vm12 = vcmp.gt.s32.totalorder %v367_v3, 1  ;;  %v377_v32 = vperm.slane %v369_v29, 0  ;;  %v419_v33 = vsel %vm383_vm11, 1, %v2851_v1  ;;  %2556 = vmatpush.bf16.msra.mxu2 %v2460_v47  ;;  %1024 = vmatpush.bf16.msra.mxu0 %v2460_v47 }
  0x47   : > { %v1948_v34 = vsel %vm1947_vm12, %v367_v3, 1  ;;  %vm386_vm13 = vcmp.lt.s32.totalorder %v3026_v4, %v376_v27  ;;  %vm389_vm0 = vcmp.lt.s32.totalorder %v3020_v2, %v3028_v9  ;;  %v412_v3 = vld [vmem:[%s3005_s13 + $0x24] sm:$0xf] }
  0x48   : > { %vm387_vm14 = vcmp.lt.s32.totalorder %v3020_v2, %v377_v32  ;;  %v1949_v35 = vcvt.s32.f32 %v1948_v34  ;;  %vm388_vm15 = vcmp.lt.s32.totalorder %v3026_v4, %v377_v32  ;;  %v422_v36 = vsel %vm386_vm13, 1, %v2851_v1  ;;  %2565 = vmatpush.bf16.msra.mxu3 %v2467_v46 }
  0x49   : > { %v423_v37 = vsel %vm387_vm14, 1, %v2851_v1  ;;  %v424_v38 = vsel %vm388_vm15, 1, %v2851_v1  ;;  %v425_v40 = vsel %vm389_vm0, 1, %v2851_v1  ;;  %1074 = vmatpush.bf16.msra.mxu1 %v2467_v46  ;;  %vm616_vm15 = vcmp.lt.s32.totalorder %v3020_v2, 7 }
  0x4a   : > { %2651 = vrcp.f32 %v1949_v35  ;;  %2557 = vmatpush.bf16.msra.mxu2 %v2459_v49  ;;  %1025 = vmatpush.bf16.msra.mxu0 %v2459_v49 }
  0x4b   : > { %466 = vperm.xlu1 %2647, %v429_v17   ;;  %460 = vperm.xlu0 %2646, %v427_v18   ;;  %v403_v18 = vld [vmem:[%s3005_s13] sm:$0xf] }
  0x4c   : > { %472 = vperm.xlu2 %2648, %v431_v20   ;;  %2566 = vmatpush.bf16.msra.mxu3 %v2466_v48 }
  0x4d   : > { %1075 = vmatpush.bf16.msra.mxu1 %v2466_v48 }
  0x4e   : > { %2558 = vmatpush.bf16.msra.mxu2 %v2458_v52  ;;  %1026 = vmatpush.bf16.msra.mxu0 %v2458_v52 }
  0x50   : > { %v2652_v39 = vpop.eup %2651  ;;  %2567 = vmatpush.bf16.msra.mxu3 %v2465_v50 }
  0x51   : > { %1076 = vmatpush.bf16.msra.mxu1 %v2465_v50 }
  0x52   : > { %2559 = vmatpush.bf16.msra.mxu2 %v2457_v54  ;;  %1027 = vmatpush.bf16.msra.mxu0 %v2457_v54 }
  0x53   : > { %478 = vperm.xlu1 %2647, %v433_v24   ;;  %475 = vperm.xlu0 %2646, %v432_v25  }
  0x54   : > { %481 = vperm.xlu2 %2648, %v434_v28   ;;  %2568 = vmatpush.bf16.msra.mxu3 %v2464_v53 }
  0x55   : > { %1077 = vmatpush.bf16.msra.mxu1 %v2464_v53 }
  0x56   : > { %2560 = vmatpush.bf16.msra.mxu2 %v2456_v56  ;;  %1028 = vmatpush.bf16.msra.mxu0 %v2456_v56 }
  0x5a   : > { %1119 = vmatpush.bf16.msrb.mxu2 %v2479_v57 }
  0x5b   : > { %439 = vperm.xlu0 %2646, %v420_v30   ;;  %442 = vperm.xlu1 %2647, %v421_v31  }
  0x5c   : > { %436 = vperm.xlu2 %2648, %v419_v33  }
  0x5e   : > { %1120 = vmatpush.bf16.msrb.mxu2 %v2478_v0  ;;  %v404_v0 = vld [vmem:[%s3005_s13 + $0x4] sm:$0xf] }
  0x62   : > { %1121 = vmatpush.bf16.msrb.mxu2 %v2477_v19 }
  0x63   : > { %445 = vperm.xlu0 %2646, %v422_v36   ;;  %448 = vperm.xlu1 %2647, %v423_v37  }
  0x64   : > { %451 = vperm.xlu2 %2648, %v424_v38  }
  0x66   : > { %1122 = vmatpush.bf16.msrb.mxu2 %v2476_v42 }
  0x6b   : > { %454 = vperm.xlu0 %2646, %v425_v40   ;;  %2009 = vperm.xlu1 %2647, %v2652_v39  }
  0x9e   : > { %v3064_v51 = vpop.permute.xlu2 %469 }
  0x9f   : > { %vm3924_vm1 = vcmp.eq.s32.totalorder %v3064_v51, 1 }
  0xa0   : > { %vm510_vm3 = vmpackc.low %vm3924_vm1, %vm3924_vm1 }
  0xa1   : > { %v3084_v63 = vsel %vm510_vm3, %v414_v59, 0 }
  0xa2   : > { %v542_v6 = vunpack.c.l.bf16 %v3084_v63 }
  0xa4   : > { %v3106_v10 = vrot.slane %v542_v6, 1 }
  0xa6   : > { %v3066_v55 = vpop.permute.xlu2 %472 }
  0xa7   : > { %vm3923_vm2 = vcmp.eq.s32.totalorder %v3066_v55, 1 }
  0xa8   : > { %vm511_vm4 = vmpackc.low %vm3923_vm2, %vm3923_vm2 }
  0xa9   : > { %v3087_v1 = vsel %vm511_vm4, %v415_v60, 0  ;;  %vm563_vm4 = vcmp.lt.s32.totalorder %v3020_v2, 1  ;;  %v558_v60 = vrot.slane %v542_v6, 7 }
  0xaa   : > { %v543_v7 = vunpack.c.l.bf16 %v3087_v1 }
  0xac   : > { %v3121_v16 = vrot.slane %v543_v7, 1 }
  0xae   : > { %v3068_v58 = vpop.permute.xlu2 %481  ;;  %v3146_v29 = vsel %vm616_vm15, %v3106_v10, %v3121_v16 }
  0xaf   : > { %vm3921_vm9 = vcmp.eq.s32.totalorder %v3068_v58, 1 }
  0xb0   : > { %vm514_vm11 = vmpackc.low %vm3921_vm9, %vm3921_vm9 }
  0xb1   : > { %v3134_v21 = vsel %vm514_vm11, %v418_v12, 0 }
  0xb2   : > { %v3931_v30 = vunpack.c.l.bf16 %v3134_v21 }
  0xb4   : > { %v3172_v46 = vrot.slane %v3931_v30, 7 }
  0xb5   : > { %v3080_v61 = vpop.permute.xlu1 %463  ;;  %v3082_v62 = vpop.permute.xlu0 %457 }
  0xb6   : > { %vm492_vm5 = vcmp.eq.s32.totalorder %v3080_v61, 1  ;;  %vm490_vm6 = vcmp.eq.s32.totalorder %v3082_v62, 1  ;;  %v3094_v5 = vpop.permute.xlu2 %436 }
  0xb7   : > { %vm508_vm7 = vmpackc.low %vm492_vm5, %vm492_vm5  ;;  %vm483_vm10 = vcmp.eq.s32.totalorder %v3094_v5, 1 }
  0xb8   : > { %vm506_vm8 = vmpackc.low %vm490_vm6, %vm490_vm6  ;;  %v524_v9 = vsel %vm508_vm7, %v412_v3, 0  ;;  %vm399_vm7 = vcmp.eq.s32.totalorder %v3020_v2, 0  ;;  %v3767_v2 = vld [vmem:[%s3916_s5] ss:$0 sm:$0xff] }
  0xb9   : > { %v3108_v11 = vsel %vm506_vm8, %v410_v8, 0  ;;  %v540_v17 = vunpack.c.l.bf16 %v524_v9  ;;  %vm499_vm14 = vmpackc.low %vm483_vm10, %vm483_vm10  ;;  %v758_v23 = vunpack.c.l.b16 %v524_v9 }
  0xba   : > { %v538_v20 = vunpack.c.l.bf16 %v3108_v11  ;;  %v3140_v25 = vsel %vm499_vm14, %v403_v18, 0 }
  0xbb   : > { %v556_v26 = vrot.slane %v540_v17, 7  ;;  %v3930_v34 = vunpack.c.l.bf16 %v3140_v25  ;;  %v609_v56 = vrot.slane %v540_v17, 1  ;;  %v405_v17 = vld [vmem:[%s3005_s13 + $0x8] sm:$0xf]  ;;  %v749_v18 = vunpack.c.l.b16 %v3140_v25 }
  0xbc   : > { %v3153_v32 = vrot.slane %v538_v20, 7  ;;  %v3174_v48 = vrot.slane %v538_v20, 1  ;;  %v760_v20 = vunpack.c.l.b16 %v3084_v63 }
  0xbd   : > { %v3114_v13 = vpop.permute.xlu1 %466  ;;  %v3117_v15 = vpop.permute.xlu0 %460  ;;  %v547_v39 = vrot.slane %v3930_v34, 7 }
  0xbe   : > { %vm3926_vm12 = vcmp.eq.s32.totalorder %v3114_v13, 1  ;;  %vm491_vm13 = vcmp.eq.s32.totalorder %v3117_v15, 1 }
  0xbf   : > { %vm509_vm0 = vmpackc.low %vm3926_vm12, %vm3926_vm12  ;;  %v579_v53 = vsel %vm563_vm4, %v3172_v46, %v547_v39 }
  0xc0   : > { %vm507_vm3 = vmpackc.low %vm491_vm13, %vm491_vm13  ;;  %v3150_v31 = vsel %vm509_vm0, %v413_v22, 0  ;;  %v584_v9 = vsel %vm399_vm7, 0.0, %v579_v53  ;;  %v416_v22 = vld [vmem:[%s3005_s13 + $0x34] sm:$0xf] }
  0xc1   : > { %v523_v24 = vsel %vm507_vm3, %v411_v14, 0  ;;  %v541_v38 = vunpack.c.l.bf16 %v3150_v31  ;;  %v2475_v14 = vld [vmem:[#allocation5 + $0x98] sm:$0xff]  ;;  %v759_v19 = vunpack.c.l.b16 %v3150_v31 }
  0xc2   : > { %v539_v27 = vunpack.c.l.bf16 %v523_v24  ;;  %v757_v28 = vunpack.c.l.b16 %v523_v24  ;;  %v653_v24 = vpack.c.bf16 %v584_v9, %v584_v9  ;;  %1123 = vmatpush.bf16.msrb.mxu2 %v2475_v14 }
  0xc3   : > { %v557_v50 = vrot.slane %v541_v38, 7  ;;  %v3185_v57 = vrot.slane %v541_v38, 1  ;;  %v559_v38 = vrot.slane %v543_v7, 7 }
  0xc4   : > { %v555_v33 = vrot.slane %v539_v27, 7  ;;  %v769_v35 = vpack.c.b16 %v758_v23, %v757_v28  ;;  %v608_v43 = vrot.slane %v539_v27, 1  ;;  %v701_v53 = vunpack.c.l.b16 %v653_v24  ;;  %v408_v24 = vld [vmem:[%s3005_s13 + $0x14] sm:$0xf] }
  0xc5   : > { %v3156_v36 = vpop.permute.xlu1 %478  ;;  %v3158_v37 = vpop.permute.xlu0 %475  ;;  %v569_v6 = vsel %vm563_vm4, %v556_v26, %v557_v50  ;;  %v568_v31 = vsel %vm563_vm4, %v557_v50, %v558_v60  ;;  %v406_v50 = vld [vmem:[%s3005_s13 + $0xc] sm:$0xf] }
  0xc6   : > { %1098 = vmatmul.bf16.vlgmr.msra.gmra.mxu3 %v769_v35  ;;  %v570_v40 = vsel %vm563_vm4, %v555_v33, %v556_v26  ;;  %v571_v41 = vsel %vm563_vm4, %v3153_v32, %v555_v33  ;;  %vm3922_vm8 = vcmp.eq.s32.totalorder %v3158_v37, 1  ;;  %v3183_v54 = vsel %vm616_vm15, %v3174_v48, %v608_v43 }
  0xc7   : > { %v592_v44 = vsel %vm399_vm7, 0.0, %v571_v41  ;;  %v662_v45 = vpack.c.bf16 %v570_v40, %v570_v40  ;;  %vm3199_vm11 = vmpackc.low %vm3922_vm8, %vm3922_vm8  ;;  %v622_v26 = vsel %vm616_vm15, %v609_v56, %v3185_v57  ;;  %v3225_v27 = vsel %vm616_vm15, %v608_v43, %v609_v56  ;;  %v3243_v43 = vpop.permute.xlu2 %451 }
  0xc8   : > { %v661_v47 = vpack.c.bf16 %v592_v44, %v592_v44  ;;  %v594_v33 = vsel %vm399_vm7, 0.0, %v569_v6  ;;  %v3239_v40 = vsel %vm3199_vm11, %v416_v22, 0  ;;  %v770_v44 = vpack.c.b16 %v760_v20, %v759_v19 }
  0xc9   : > { %v710_v49 = vunpack.c.l.b16 %v662_v45  ;;  %v663_v45 = vpack.c.bf16 %v594_v33, %v594_v33  ;;  %v3932_v56 = vunpack.c.l.bf16 %v3239_v40 }
  0xca   : > { %v709_v52 = vunpack.c.l.b16 %v661_v47  ;;  %v664_v47 = vpack.c.bf16 %v568_v31, %v568_v31 }
  0xcb   : > { %v711_v14 = vunpack.c.l.b16 %v663_v45 }
  0xcc   : > { %v721_v59 = vpack.c.b16 %v710_v49, %v709_v52 }
  0xcd   : > { %v3190_v3 = vpop.permute.xlu0 %439  ;;  %v3192_v8 = vpop.permute.xlu1 %442 }
  0xce   : > { %1049 = vmatmul.bf16.vlgmr.msra.gmra.mxu2 %v721_v59  ;;  %vm484_vm14 = vcmp.eq.s32.totalorder %v3190_v3, 1  ;;  %vm485_vm0 = vcmp.eq.s32.totalorder %v3192_v8, 1 }
  0xcf   : > { %vm500_vm3 = vmpackc.low %vm484_vm14, %vm484_vm14 }
  0xd0   : > { %v3215_v23 = vsel %vm500_vm3, %v404_v0, 0  ;;  %vm501_vm9 = vmpackc.low %vm485_vm0, %vm485_vm0  ;;  %v2474_v0 = vld [vmem:[#allocation5 + $0x90] sm:$0xff]  ;;  %vm488_vm3 = vcmp.eq.s32.totalorder %v3243_v43, 1 }
  0xd1   : > { %v3929_v63 = vunpack.c.l.bf16 %v3215_v23  ;;  %v750_v28 = vunpack.c.l.b16 %v3215_v23  ;;  %v3233_v35 = vsel %vm501_vm9, %v405_v17, 0  ;;  %vm3925_vm9 = vcmp.eq.s32.totalorder %v3156_v36, 1  ;;  %1124 = vmatpush.bf16.msrb.mxu2 %v2474_v0  ;;  %vm504_vm1 = vmpackc.low %vm488_vm3, %vm488_vm3 }
  0xd2   : > { %v3928_v49 = vunpack.c.l.bf16 %v3233_v35  ;;  %v712_v17 = vunpack.c.l.b16 %v664_v47  ;;  %vm513_vm2 = vmpackc.low %vm3925_vm9, %vm3925_vm9  ;;  %v761_v47 = vunpack.c.l.b16 %v3087_v1 }
  0xd3   : > { %v548_v41 = vrot.slane %v3929_v63, 7  ;;  %v765_v42 = vpack.c.b16 %v750_v28, %v749_v18  ;;  %v417_v18 = vld [vmem:[%s3005_s13 + $0x38] sm:$0xf] }
  0xd4   : > { %v549_v19 = vrot.slane %v3928_v49, 7  ;;  %v3287_v33 = vsel %vm513_vm2, %v417_v18, 0 }
  0xd5   : > { %1078 = vmatmul.bf16.vlgmr.msra.gmra.mxu1 %v765_v42  ;;  %v3247_v52 = vpop.permute.xlu0 %445  ;;  %v578_v7 = vsel %vm563_vm4, %v547_v39, %v548_v41  ;;  %v567_v39 = vsel %vm563_vm4, %v558_v60, %v559_v38  ;;  %v3262_v12 = vpop.permute.xlu1 %448  ;;  %v3273_v60 = vrot.slane %v3932_v56, 7  ;;  %v722_v42 = vpack.c.b16 %v712_v17, %v711_v14 }
  0xd6   : > { %1103 = vmatmul.bf16.gmra.mxu3 %v770_v44  ;;  %vm486_vm11 = vcmp.eq.s32.totalorder %v3247_v52, 1  ;;  %v654_v59 = vpack.c.bf16 %v578_v7, %v578_v7  ;;  %vm487_vm9 = vcmp.eq.s32.totalorder %v3262_v12, 1  ;;  %v596_v31 = vsel %vm399_vm7, 0.0, %v567_v39  ;;  %v409_v44 = vld [vmem:[%s3005_s13 + $0x18] sm:$0xf]  ;;  %v2473_v39 = vld [vmem:[#allocation5 + $0x88] sm:$0xff] }
  0xd7   : > { %vm502_vm8 = vmpackc.low %vm486_vm11, %vm486_vm11  ;;  %v566_v1 = vsel %vm563_vm4, %v559_v38, %v3273_v60  ;;  %v762_v14 = vunpack.c.l.b16 %v3239_v40  ;;  %1125 = vmatpush.bf16.msrb.mxu2 %v2473_v39 }
  0xd8   : > { %v3260_v9 = vsel %vm502_vm8, %v406_v50, 0  ;;  %v702_v6 = vunpack.c.l.b16 %v654_v59  ;;  %vm402_vm8 = vcmp.eq.s32.totalorder %v3026_v4, 15  ;;  %v577_v50 = vsel %vm563_vm4, %v548_v41, %v549_v19  ;;  %v407_v59 = vld [vmem:[%s3005_s13 + $0x10] sm:$0xf]  ;;  %vm3303_vm2 = vmpackc.low %vm487_vm9, %vm487_vm9  ;;  %s2083_s13 = scalar_lea.hbm %s3917_s6, %s2505_s20 }
  0xd9   : > { %v3927_v20 = vunpack.c.l.bf16 %v3260_v9  ;;  %v646_v7 = vsel %vm402_vm8, 0.0, %v622_v26  ;;  %v665_v41 = vpack.c.bf16 %v596_v31, %v596_v31  ;;  %v545_v26 = vunpack.c.l.bf16 %v3287_v33  ;;  %s2086_s30 = sshll.u32 %s2083_s13, 4  ;;  %s2087_s30 = int_to_ptr.hbm [resolvable:$true] %s2086_s30 }
  0xda   : > { %v717_v22 = vpack.c.b16 %v702_v6, %v701_v53  ;;  %v3297_v53 = vsel %vm504_vm1, %v408_v24, 0  ;;  %v752_v6 = vunpack.c.l.b16 %v3260_v9  ;;  %v586_v38 = vsel %vm399_vm7, 0.0, %v577_v50  ;;  %s2757_s21 = sshra.s32 %s2087_s30, 4  ;;  %s2758_s21 = int_to_ptr.hbm [resolvable:$true] %s2757_s21 }
  0xdb   : > { %v3282_v28 = vrot.slane %v3927_v20, 7  ;;  %v678_v24 = vpack.c.bf16 %v646_v7, %v646_v7  ;;  %v3328_v31 = vsel %vm3303_vm2, %v407_v59, 0  ;;  %v751_v20 = vunpack.c.l.b16 %v3233_v35  ;;  %s2759_s29 = scalar_lea.hbm %s2758_s21, 64  ;;  %p2764_p2 = scmp.lt.s32.totalorder %s2758_s21, %s3917_s6 }
  0xdc   : > { %1029 = vmatmul.bf16.vlgmr.msra.gmra.mxu0 %v717_v22  ;;  %v677_v22 = vpack.c.bf16 %v3225_v27, %v3225_v27  ;;  %v666_v49 = vpack.c.bf16 %v566_v1, %v566_v1  ;;  %v771_v63 = vpack.c.b16 %v762_v14, %v761_v47  ;;  %v655_v27 = vpack.c.bf16 %v586_v38, %v586_v38  ;;  %p2760_p1 = scmp.ne.s32.totalorder %s2758_s21, %s2759_s29  ;;  %p2765_p9 = scmp.lt.s32.totalorder %s2763_s16, %s2759_s29 }
  0xdd   : > { %v3290_v45 = vpop.permute.xlu0 %454  ;;  %v576_v17 = vsel %vm563_vm4, %v549_v19, %v3282_v28  ;;  %v766_v39 = vpack.c.b16 %v752_v6, %v751_v20  ;;  %v535_v7 = vunpack.c.l.bf16 %v3328_v31  ;;  %v3343_v34 = vunpack.c.l.b16 %v678_v24  ;;  %v3792_v52 = vpop.permute.xlu1 %2009 }
  0xde   : > { %1054 = vmatmul.bf16.gmra.mxu2 %v722_v42  ;;  %vm489_vm12 = vcmp.eq.s32.totalorder %v3290_v45, 1  ;;  %v656_v19 = vpack.c.bf16 %v576_v17, %v576_v17  ;;  %v3341_v0 = vunpack.c.l.b16 %v677_v22  ;;  %v561_v1 = vrot.slane %v545_v26, 7  ;;  %p2761_p4 = pnand %p2760_p1, %p2966_p3  ;;  %p2766_p10 = por %p2765_p9, %p2764_p2 }
  0xdf   : > { %vm505_vm1 = vmpackc.low %vm489_vm12, %vm489_vm12  ;;  %v713_v17 = vunpack.c.l.b16 %v665_v41  ;;  %v714_v30 = vunpack.c.l.b16 %v666_v49  ;;  %v614_v50 = vrot.slane %v545_v26, 1  ;;  %v3947_v20 = vunpack.c.l.bf16 %v3239_v40 }
  0xe0   : > { %v3320_v18 = vsel %vm505_vm1, %v409_v44, 0  ;;  %v644_v44 = vsel %vm402_vm8, 0.0, %v3183_v54  ;;  %v2472_v54 = vld [vmem:[#allocation5 + $0x80] sm:$0xff]  ;;  %v704_v6 = vunpack.c.l.b16 %v656_v19  ;;  %v3948_v14 = vunpack.c.l.bf16 %v3134_v21  ;;  %p2762_p11 = pneg %p2761_p4 }
  0xe1   : > { %v3933_v42 = vunpack.c.l.bf16 %v3320_v18  ;;  %v676_v56 = vpack.c.bf16 %v644_v44, %v644_v44  ;;  %v613_v47 = vrot.slane %v3947_v20, 1  ;;  %v3949_v22 = vunpack.c.l.bf16 %v3140_v25  ;;  %1126 = vmatpush.bf16.msrb.mxu2 %v2472_v54 }
  0xe2   : > { %v615_v38 = vrot.slane %v3948_v14, 1  ;;  %v3950_v24 = vunpack.c.l.bf16 %v3297_v53  ;;  %v764_v49 = vunpack.c.l.b16 %v3134_v21  ;;  %v551_v40 = vrot.slane %v535_v7, 7  ;;  %p2767_p12 = pnand %p2766_p10, %p2762_p11 }
  0xe3   : > { %v3339_v59 = vrot.slane %v3933_v42, 1  ;;  %v3351_v42 = vrot.slane %v3949_v22, 1  ;;  %v703_v41 = vunpack.c.l.b16 %v655_v27  ;;  %v817_v25 = vpack.c.b16 %v3343_v34, %v3341_v0 }
  0xe4   : > { %v723_v26 = vpack.c.b16 %v714_v30, %v713_v17  ;;  %v565_v19 = vsel %vm563_vm4, %v3273_v60, %v561_v1  ;;  %v3369_v21 = vunpack.c.l.b16 %v676_v56  ;;  %v621_v27 = vsel %vm616_vm15, %v3185_v57, %v3106_v10 }
  0xe5   : > { %1083 = vmatmul.bf16.gmra.mxu1 %v766_v39  ;;  %v3355_v39 = vrot.slane %v3950_v24, 7  ;;  %v718_v54 = vpack.c.b16 %v704_v6, %v703_v41  ;;  %v618_v30 = vsel %vm616_vm15, %v613_v47, %v614_v50  ;;  %v753_v17 = vunpack.c.l.b16 %v3328_v31 }
  0xe6   : > { %1108 = vmatmul.bf16.gmra.mxu3 %v771_v63  ;;  %v625_v63 = vsel %vm616_vm15, %v3339_v59, %v3174_v48  ;;  %v648_v48 = vsel %vm402_vm8, 0.0, %v3146_v29  ;;  %v679_v60 = vpack.c.bf16 %v621_v27, %v621_v27  ;;  %v575_v6 = vsel %vm563_vm4, %v3282_v28, %v551_v40 }
  0xe7   : > { %v675_v44 = vpack.c.bf16 %v625_v63, %v625_v63  ;;  %v680_v56 = vpack.c.bf16 %v648_v48, %v648_v48  ;;  %v619_v10 = vsel %vm616_vm15, %v3121_v16, %v613_v47  ;;  %v650_v29 = vsel %vm402_vm8, 0.0, %v618_v30 }
  0xe8   : > { %v617_v57 = vsel %vm616_vm15, %v614_v50, %v615_v38  ;;  %v3395_v22 = vunpack.c.l.b16 %v679_v60  ;;  %v681_v41 = vpack.c.bf16 %v619_v10, %v619_v10  ;;  %v574_v28 = vsel %vm563_vm4, %v551_v40, %v3355_v39 }
  0xe9   : > { %v3381_v20 = vunpack.c.l.b16 %v675_v44  ;;  %v3397_v24 = vunpack.c.l.b16 %v680_v56  ;;  %v682_v16 = vpack.c.bf16 %v650_v29, %v650_v29  ;;  %v632_v47 = vsel %vm616_vm15, %v615_v38, %v3351_v42 }
  0xea   : > { %v683_v63 = vpack.c.bf16 %v617_v57, %v617_v57  ;;  %v588_v50 = vsel %vm399_vm7, 0.0, %v575_v6  ;;  %v763_v27 = vunpack.c.l.b16 %v3287_v33  ;;  %v754_v38 = vunpack.c.l.b16 %v3297_v53 }
  0xeb   : > { %v816_v14 = vpack.c.b16 %v3369_v21, %v3381_v20  ;;  %v818_v44 = vpack.c.b16 %v3397_v24, %v3395_v22  ;;  %v3414_v40 = vunpack.c.l.b16 %v682_v16  ;;  %v564_v60 = vsel %vm563_vm4, %v561_v1, %v3172_v46  ;;  %v2494_v21 = vld [vmem:[#allocation7 + $0x70] sm:$0xff]  ;;  %v2493_v20 = vld [vmem:[#allocation7 + $0x68] sm:$0xff]  ;;  %v2503_v22 = vld [vmem:[#allocation7 + $0xb8] sm:$0xff] }
  0xec   : > { %1034 = vmatmul.bf16.gmra.mxu0 %v718_v54  ;;  %v3409_v54 = vunpack.c.l.b16 %v681_v41  ;;  %v3416_v30 = vunpack.c.l.b16 %v683_v63  ;;  %v598_v56 = vsel %vm399_vm7, 0.0, %v565_v19  ;;  %v657_v6 = vpack.c.bf16 %v588_v50, %v588_v50  ;;  %1798 = vmatpush.bf16.msrb.mxu1 %v2503_v22  ;;  %v2491_v24 = vld [vmem:[#allocation7 + $0x58] sm:$0xff] }
  0xed   : > { %v658_v10 = vpack.c.bf16 %v574_v28, %v574_v28  ;;  %v767_v57 = vpack.c.b16 %v754_v38, %v753_v17  ;;  %v772_v41 = vpack.c.b16 %v764_v49, %v763_v27  ;;  %v667_v16 = vpack.c.bf16 %v598_v56, %v598_v56 }
  0xee   : > { %1059 = vmatmul.bf16.gmra.mxu2 %v723_v26  ;;  %v652_v26 = vsel %vm402_vm8, 0.0, %v632_v47  ;;  %v668_v47 = vpack.c.bf16 %v564_v60, %v564_v60  ;;  %v705_v46 = vunpack.c.l.b16 %v657_v6  ;;  %v3951_v19 = vunpack.c.l.bf16 %v3320_v18 }
  0xef   : > { %v684_v48 = vpack.c.bf16 %v652_v26, %v652_v26  ;;  %v706_v1 = vunpack.c.l.b16 %v658_v10  ;;  %v715_v28 = vunpack.c.l.b16 %v667_v16  ;;  %v3952_v29 = vunpack.c.l.bf16 %v3215_v23 }
  0xf0   : > { %v553_v50 = vrot.slane %v3951_v19, 7  ;;  %v716_v26 = vunpack.c.l.b16 %v668_v47  ;;  %v3953_v17 = vunpack.c.l.bf16 %v3233_v35  ;;  %v755_v6 = vunpack.c.l.b16 %v3320_v18 }
  0xf1   : > { %v3426_v33 = vunpack.c.l.b16 %v684_v48  ;;  %v601_v48 = vrot.slane %v3952_v29, 1  ;;  %v719_v27 = vpack.c.b16 %v706_v1, %v705_v46  ;;  %v756_v10 = vunpack.c.l.b16 %v3108_v11 }
  0xf2   : > { %v602_v49 = vrot.slane %v3953_v17, 1  ;;  %v724_v38 = vpack.c.b16 %v716_v26, %v715_v28  ;;  %v573_v60 = vsel %vm563_vm4, %v3355_v39, %v553_v50  ;;  %v572_v23 = vsel %vm563_vm4, %v553_v50, %v3153_v32 }
  0xf3   : > { %v820_v63 = vpack.c.b16 %v3426_v33, %v3416_v30  ;;  %v590_v35 = vsel %vm399_vm7, 0.0, %v573_v60  ;;  %v631_v29 = vsel %vm616_vm15, %v3351_v42, %v601_v48  ;;  %v768_v16 = vpack.c.b16 %v756_v10, %v755_v6  ;;  %v2499_v30 = vld [vmem:[#allocation7 + $0x98] sm:$0xff] }
  0xf4   : > { %v630_v56 = vsel %vm616_vm15, %v601_v48, %v602_v49  ;;  %v669_v18 = vpack.c.bf16 %v631_v29, %v631_v29  ;;  %v3954_v50 = vunpack.c.l.bf16 %v3260_v9  ;;  %v604_v28 = vrot.slane %v535_v7, 1 }
  0xf5   : > { %1088 = vmatmul.bf16.gmra.mxu1 %v767_v57  ;;  %v638_v39 = vsel %vm402_vm8, 0.0, %v630_v56  ;;  %v659_v57 = vpack.c.bf16 %v590_v35, %v590_v35  ;;  %v3955_v31 = vunpack.c.l.bf16 %v3297_v53  ;;  %v3956_v34 = vpack.c.b16 %v3414_v40, %v3409_v54 }
  0xf6   : > { %1113 = vmatmul.bf16.gmra.mxu3 %v772_v41  ;;  %v660_v41 = vpack.c.bf16 %v572_v23, %v572_v23  ;;  %v670_v47 = vpack.c.bf16 %v638_v39, %v638_v39  ;;  %v797_v1 = vunpack.c.l.b16 %v669_v18  ;;  %v603_v11 = vrot.slane %v3954_v50, 1  ;;  %v2495_v18 = vld [vmem:[#allocation7 + $0x78] sm:$0xff]  ;;  %v2500_v50 = vld [vmem:[#allocation7 + $0xa0] sm:$0xff] }
  0xf7   : > { %v707_v46 = vunpack.c.l.b16 %v659_v57  ;;  %v605_v7 = vrot.slane %v3955_v31, 1  ;;  %1749 = vmatpush.bf16.msrb.mxu0 %v2495_v18  ;;  %vm3957_vm2 = vcmp.eq.s32.totalorder %v3114_v13, 1  ;;  %vm3958_vm1 = vcmp.eq.s32.totalorder %v3064_v51, 1 }
  0xf8   : > { %v708_v32 = vunpack.c.l.b16 %v660_v41  ;;  %v798_v19 = vunpack.c.l.b16 %v670_v47  ;;  %v628_v48 = vsel %vm616_vm15, %v603_v11, %v604_v28  ;;  %v629_v17 = vsel %vm616_vm15, %v602_v49, %v603_v11 }
  0xf9   : > { %v626_v23 = vsel %vm616_vm15, %v605_v7, %v3339_v59  ;;  %v627_v49 = vsel %vm616_vm15, %v604_v28, %v605_v7 }
  0xfa   : > { %v720_v42 = vpack.c.b16 %v708_v32, %v707_v46  ;;  %v813_v26 = vpack.c.b16 %v798_v19, %v797_v1  ;;  %v642_v35 = vsel %vm402_vm8, 0.0, %v626_v23  ;;  %v673_v29 = vpack.c.bf16 %v627_v49, %v627_v49  ;;  %v2490_v32 = vld [vmem:[#allocation7 + $0x50] sm:$0xff]  ;;  %v2501_v1 = vld [vmem:[#allocation7 + $0xa8] sm:$0xff] }
  0xfb   : > { %v674_v10 = vpack.c.bf16 %v642_v35, %v642_v35  ;;  %1750 = vmatpush.bf16.msrb.mxu0 %v2494_v21  ;;  %v2489_v19 = vld [vmem:[#allocation7 + $0x48] sm:$0xff] }
  0xfc   : > { %1039 = vmatmul.bf16.gmra.mxu0 %v719_v27  ;;  %v640_v27 = vsel %vm402_vm8, 0.0, %v628_v48  ;;  %v801_v57 = vunpack.c.l.b16 %v673_v29  ;;  %v3506_v48 = vld [vmem:[%s3914_s3] ss:$0 sm:$0xff] }
  0xfd   : > { %v672_v60 = vpack.c.bf16 %v640_v27, %v640_v27  ;;  %v802_v39 = vunpack.c.l.b16 %v674_v10 }
  0xfe   : > { %1064 = vmatmul.bf16.gmra.mxu2 %v724_v38  ;;  %v671_v38 = vpack.c.bf16 %v629_v17, %v629_v17  ;;  %v2497_v17 = vld [vmem:[#allocation7 + $0x88] sm:$0xff] }
  0xff   : > { %v800_v56 = vunpack.c.l.b16 %v672_v60  ;;  %v815_v41 = vpack.c.b16 %v802_v39, %v801_v57  ;;  %1751 = vmatpush.bf16.msrb.mxu0 %v2493_v20 }
 0x100   : > { %v799_v9 = vunpack.c.l.b16 %v671_v38 }
 0x102   : > { %v814_v6 = vpack.c.b16 %v800_v56, %v799_v9  ;;  %v2496_v9 = vld [vmem:[#allocation7 + $0x80] sm:$0xff] }
 0x105   : > { %1093 = vmatmul.bf16.gmra.mxu1 %v768_v16 }
 0x10c   : > { %1044 = vmatmul.bf16.gmra.mxu0 %v720_v42  ;;  %v2488_v42 = vld [vmem:[#allocation7 + $0x40] sm:$0xff] }
 0x10e   : > { %1127 = vmatmul.bf16.vlgmr.msrb.gmra.mxu2 %v813_v26 }
 0x11e   : > { %1132 = vmatmul.bf16.gmra.mxu2 %v814_v6 }
 0x12e   : > { %1137 = vmatmul.bf16.gmra.mxu2 %v815_v41 }
 0x13e   : > { %1142 = vmatmul.bf16.gmra.mxu2 %v816_v14  ;;  %v2492_v14 = vld [vmem:[#allocation7 + $0x60] sm:$0xff] }
 0x13f   : > { %1752 = vmatpush.bf16.msrb.mxu0 %v2492_v14 }
 0x143   : > { %1753 = vmatpush.bf16.msrb.mxu0 %v2491_v24 }
 0x147   : > { %1754 = vmatpush.bf16.msrb.mxu0 %v2490_v32 }
 0x14b   : > { %1755 = vmatpush.bf16.msrb.mxu0 %v2489_v19 }
 0x14e   : > { %1147 = vmatmul.bf16.gmra.mxu2 %v817_v25 }
 0x14f   : > { %1756 = vmatpush.bf16.msrb.mxu0 %v2488_v42 }
 0x151   : > { %v3478_v53 = vpop.f32.mrf.mxu2 }
 0x152   : > { %v1079_v54 = vpop.f32.mrf.mxu1 }
 0x159   : > { %v3480_v59 = vpop.f32.mrf.mxu2  ;;  %v1030_v46 = vpop.f32.mrf.mxu0 }
 0x15a   : > { %v1081_v33 = vpop.f32.mrf.mxu1  ;;  %v1080_v26 = vadd.f32 %v1079_v54, %v1030_v46 }
 0x15e   : > { %1152 = vmatmul.bf16.gmra.mxu2 %v818_v44  ;;  %v2502_v44 = vld [vmem:[#allocation7 + $0xb0] sm:$0xff] }
 0x15f   : > { %1799 = vmatpush.bf16.msrb.mxu1 %v2502_v44 }
 0x161   : > { %v3485_v16 = vpop.f32.mrf.mxu2  ;;  %v1032_v11 = vpop.f32.mrf.mxu0 }
 0x162   : > { %v1084_v31 = vpop.f32.mrf.mxu1  ;;  %v1082_v7 = vadd.f32 %v1081_v33, %v1032_v11 }
 0x163   : > { %1800 = vmatpush.bf16.msrb.mxu1 %v2501_v1 }
 0x167   : > { %1801 = vmatpush.bf16.msrb.mxu1 %v2500_v50 }
 0x169   : > { %v3487_v47 = vpop.f32.mrf.mxu2  ;;  %v1035_v60 = vpop.f32.mrf.mxu0 }
 0x16a   : > { %v1086_v57 = vpop.f32.mrf.mxu1  ;;  %v1085_v18 = vadd.f32 %v1084_v31, %v1035_v60 }
 0x16b   : > { %1802 = vmatpush.bf16.msrb.mxu1 %v2499_v30 }
 0x16e   : > { %1157 = vmatmul.bf16.gmra.mxu2 %v3956_v34 }
 0x171   : > { %v3492_v0 = vpop.f32.mrf.mxu2  ;;  %v1037_v29 = vpop.f32.mrf.mxu0 }
 0x172   : > { %v1087_v50 = vadd.f32 %v1086_v57, %v1037_v29  ;;  %v1089_v30 = vpop.f32.mrf.mxu1 }
 0x179   : > { %v3494_v25 = vpop.f32.mrf.mxu2  ;;  %v1040_v19 = vpop.f32.mrf.mxu0 }
 0x17e   : > { %1162 = vmatmul.bf16.gmra.mxu2 %v820_v63  ;;  %v2498_v63 = vld [vmem:[#allocation7 + $0x90] sm:$0xff] }
 0x17f   : > { %1803 = vmatpush.bf16.msrb.mxu1 %v2498_v63 }
 0x181   : > { %v3499_v40 = vpop.f32.mrf.mxu2 }
 0x183   : > { %1804 = vmatpush.bf16.msrb.mxu1 %v2497_v17 }
 0x187   : > { %1805 = vmatpush.bf16.msrb.mxu1 %v2496_v9 }
 0x189   : > { %v3501_v28 = vpop.f32.mrf.mxu2 }
 0x191   : > { %v1128_v27 = vpop.f32.mrf.mxu2 }
 0x192   : > { %v1129_v38 = vadd.f32 %v1128_v27, %v1080_v26 }
 0x194   : > { %v1172_v56 = vadd.f32 %v3506_v48, %v1129_v38 }
 0x196   : > { %v1188_v6 = vmax.f32 %v1172_v56, 0.0 }
 0x198   : > { %v3511_v49 = vsel %vm483_vm10, %v1188_v6, 0.0 }
 0x199   : > { %v1130_v23 = vpop.f32.mrf.mxu2  ;;  %v1220_v41 = vpack.c.bf16 %v3511_v49, %v3511_v49  ;;  %v1284_v32 = vrot.slane %v3511_v49, 1 }
 0x19a   : > { %v1131_v35 = vadd.f32 %v1130_v23, %v1082_v7  ;;  %v1090_v23 = vadd.f32 %v1089_v30, %v1040_v19 }
 0x19b   : > { %v1428_v22 = vunpack.c.l.b16 %v1220_v41 }
 0x19c   : > { %v1173_v10 = vadd.f32 %v3506_v48, %v1131_v35 }
 0x19e   : > { %v1189_v39 = vmax.f32 %v1173_v10, 0.0  ;;  %v1042_v10 = vpop.f32.mrf.mxu0 }
 0x1a0   : > { %v3518_v21 = vsel %vm484_vm14, %v1189_v39, 0.0 }
 0x1a1   : > { %v1133_v20 = vpop.f32.mrf.mxu2  ;;  %v1221_v34 = vpack.c.bf16 %v3518_v21, %v3518_v21  ;;  %v1285_v44 = vrot.slane %v3518_v21, 1 }
 0x1a2   : > { %v1134_v14 = vadd.f32 %v1133_v20, %v1085_v18  ;;  %v1091_v18 = vpop.f32.mrf.mxu1 }
 0x1a3   : > { %v1429_v24 = vunpack.c.l.b16 %v1221_v34  ;;  %v1314_v42 = vsel %vm616_vm15, %v1284_v32, %v1285_v44 }
 0x1a4   : > { %v1174_v46 = vadd.f32 %v3506_v48, %v1134_v14  ;;  %v1348_v27 = vpack.c.bf16 %v1314_v42, %v1314_v42 }
 0x1a5   : > { %v1444_v54 = vpack.c.b16 %v1429_v24, %v1428_v22 }
 0x1a6   : > { %v1190_v1 = vmax.f32 %v1174_v46, 0.0  ;;  %v1476_v31 = vunpack.c.l.b16 %v1348_v27  ;;  %v1092_v46 = vadd.f32 %v1091_v18, %v1042_v10  ;;  %v1045_v30 = vpop.f32.mrf.mxu0  ;;  %v1099_v10 = vpop.f32.mrf.mxu3 }
 0x1a7   : > { %1757 = vmatmul.bf16.vlgmr.msrb.gmra.mxu0 %v1444_v54 }
 0x1a8   : > { %v3527_v11 = vsel %vm485_vm0, %v1190_v1, 0.0 }
 0x1a9   : > { %v1286_v33 = vrot.slane %v3527_v11, 1  ;;  %v1135_v63 = vpop.f32.mrf.mxu2  ;;  %v1222_v6 = vpack.c.bf16 %v3527_v11, %v3527_v11 }
 0x1aa   : > { %v1136_v26 = vadd.f32 %v1135_v63, %v1087_v50 }
 0x1ab   : > { %v1313_v17 = vsel %vm616_vm15, %v1285_v44, %v1286_v33  ;;  %v1430_v20 = vunpack.c.l.b16 %v1222_v6 }
 0x1ac   : > { %v1175_v38 = vadd.f32 %v3506_v48, %v1136_v26  ;;  %v1317_v60 = vsel %vm402_vm8, 0.0, %v1313_v17 }
 0x1ad   : > { %v1349_v9 = vpack.c.bf16 %v1317_v60, %v1317_v60 }
 0x1ae   : > { %v1191_v56 = vmax.f32 %v1175_v38, 0.0  ;;  %v1094_v38 = vpop.f32.mrf.mxu1 }
 0x1af   : > { %v1477_v7 = vunpack.c.l.b16 %v1349_v9 }
 0x1b0   : > { %v3543_v35 = vsel %vm486_vm11, %v1191_v56, 0.0 }
 0x1b1   : > { %v1138_v29 = vpop.f32.mrf.mxu2  ;;  %v1492_v39 = vpack.c.b16 %v1477_v7, %v1476_v31  ;;  %v1223_v57 = vpack.c.bf16 %v3543_v35, %v3543_v35  ;;  %v1287_v22 = vrot.slane %v3543_v35, 1  ;;  %v1095_v7 = vadd.f32 %v1094_v38, %v1045_v30 }
 0x1b2   : > { %v1139_v41 = vadd.f32 %v1138_v29, %v1090_v23  ;;  %v2487_v23 = vld [vmem:[#allocation7 + $0x38] sm:$0xff] }
 0x1b3   : > { %1806 = vmatmul.bf16.vlgmr.msrb.gmra.mxu1 %v1492_v39  ;;  %v1431_v34 = vunpack.c.l.b16 %v1223_v57  ;;  %v1312_v1 = vsel %vm616_vm15, %v1286_v33, %v1287_v22  ;;  %1700 = vmatpush.bf16.msrb.mxu3 %v2487_v23 }
 0x1b4   : > { %v1176_v14 = vadd.f32 %v3506_v48, %v1139_v41  ;;  %v1350_v26 = vpack.c.bf16 %v1312_v1, %v1312_v1 }
 0x1b5   : > { %v1445_v24 = vpack.c.b16 %v1431_v34, %v1430_v20 }
 0x1b6   : > { %v1192_v44 = vmax.f32 %v1176_v14, 0.0  ;;  %v1478_v56 = vunpack.c.l.b16 %v1350_v26  ;;  %v2486_v26 = vld [vmem:[#allocation7 + $0x30] sm:$0xff] }
 0x1b7   : > { %1762 = vmatmul.bf16.gmra.mxu0 %v1445_v24  ;;  %1701 = vmatpush.bf16.msrb.mxu3 %v2486_v26 }
 0x1b8   : > { %v3551_v54 = vsel %vm487_vm9, %v1192_v44, 0.0 }
 0x1b9   : > { %v1288_v19 = vrot.slane %v3551_v54, 1  ;;  %v1140_v50 = vpop.f32.mrf.mxu2  ;;  %v1224_v33 = vpack.c.bf16 %v3551_v54, %v3551_v54 }
 0x1ba   : > { %v1141_v42 = vadd.f32 %v1140_v50, %v1092_v46  ;;  %v1096_v46 = vpop.f32.mrf.mxu1 }
 0x1bb   : > { %v1311_v63 = vsel %vm616_vm15, %v1287_v22, %v1288_v19  ;;  %v1432_v18 = vunpack.c.l.b16 %v1224_v33  ;;  %v1047_v22 = vpop.f32.mrf.mxu0 }
 0x1bc   : > { %v1177_v17 = vadd.f32 %v3506_v48, %v1141_v42  ;;  %v1319_v27 = vsel %vm402_vm8, 0.0, %v1311_v63  ;;  %v1097_v1 = vadd.f32 %v1096_v46, %v1047_v22 }
 0x1bd   : > { %v1351_v60 = vpack.c.bf16 %v1319_v27, %v1319_v27  ;;  %v1101_v27 = vpop.f32.mrf.mxu3 }
 0x1be   : > { %v1193_v9 = vmax.f32 %v1177_v17, 0.0 }
 0x1bf   : > { %v1479_v31 = vunpack.c.l.b16 %v1351_v60 }
 0x1c0   : > { %v3565_v6 = vsel %vm488_vm3, %v1193_v9, 0.0 }
 0x1c1   : > { %v1143_v29 = vpop.f32.mrf.mxu2  ;;  %v1493_v39 = vpack.c.b16 %v1479_v31, %v1478_v56  ;;  %v1225_v57 = vpack.c.bf16 %v3565_v6, %v3565_v6  ;;  %v1289_v14 = vrot.slane %v3565_v6, 1 }
 0x1c2   : > { %v1144_v41 = vadd.f32 %v1143_v29, %v1095_v7  ;;  %v1100_v29 = vadd.f32 %v1099_v10, %v3478_v53 }
 0x1c3   : > { %1811 = vmatmul.bf16.gmra.mxu1 %v1493_v39  ;;  %v1433_v20 = vunpack.c.l.b16 %v1225_v57  ;;  %v1310_v42 = vsel %vm616_vm15, %v1288_v19, %v1289_v14  ;;  %v2485_v57 = vld [vmem:[#allocation7 + $0x28] sm:$0xff] }
 0x1c4   : > { %v1178_v34 = vadd.f32 %v3506_v48, %v1144_v41  ;;  %v1352_v60 = vpack.c.bf16 %v1310_v42, %v1310_v42  ;;  %1702 = vmatpush.bf16.msrb.mxu3 %v2485_v57 }
 0x1c5   : > { %v1446_v24 = vpack.c.b16 %v1433_v20, %v1432_v18  ;;  %v1104_v53 = vpop.f32.mrf.mxu3 }
 0x1c6   : > { %v1194_v44 = vmax.f32 %v1178_v34, 0.0  ;;  %v1480_v7 = vunpack.c.l.b16 %v1352_v60 }
 0x1c7   : > { %1767 = vmatmul.bf16.gmra.mxu0 %v1446_v24 }
 0x1c8   : > { %v3573_v50 = vsel %vm489_vm12, %v1194_v44, 0.0 }
 0x1c9   : > { %v1290_v30 = vrot.slane %v3573_v50, 1  ;;  %v1145_v63 = vpop.f32.mrf.mxu2  ;;  %v1226_v23 = vpack.c.bf16 %v3573_v50, %v3573_v50 }
 0x1ca   : > { %v1146_v17 = vadd.f32 %v1145_v63, %v1097_v1  ;;  %v1102_v1 = vadd.f32 %v1101_v27, %v3480_v59 }
 0x1cb   : > { %v1309_v38 = vsel %vm616_vm15, %v1289_v14, %v1290_v30  ;;  %v1434_v14 = vunpack.c.l.b16 %v1226_v23 }
 0x1cc   : > { %v1179_v9 = vadd.f32 %v3506_v48, %v1146_v17  ;;  %v1321_v56 = vsel %vm402_vm8, 0.0, %v1309_v38  ;;  %v2484_v38 = vld [vmem:[#allocation7 + $0x20] sm:$0xff] }
 0x1cd   : > { %v1353_v31 = vpack.c.bf16 %v1321_v56, %v1321_v56  ;;  %1703 = vmatpush.bf16.msrb.mxu3 %v2484_v38 }
 0x1ce   : > { %v1195_v33 = vmax.f32 %v1179_v9, 0.0 }
 0x1cf   : > { %v1481_v19 = vunpack.c.l.b16 %v1353_v31 }
 0x1d0   : > { %v3588_v39 = vsel %vm490_vm6, %v1195_v33, 0.0 }
 0x1d1   : > { %v1148_v41 = vpop.f32.mrf.mxu2  ;;  %v1494_v18 = vpack.c.b16 %v1481_v19, %v1480_v7  ;;  %v1227_v20 = vpack.c.bf16 %v3588_v39, %v3588_v39  ;;  %v1291_v44 = vrot.slane %v3588_v39, 1  ;;  %v1106_v7 = vpop.f32.mrf.mxu3 }
 0x1d2   : > { %v1149_v34 = vadd.f32 %v1148_v41, %v1100_v29  ;;  %v1105_v29 = vadd.f32 %v1104_v53, %v3485_v16  ;;  %v2483_v41 = vld [vmem:[#allocation7 + $0x18] sm:$0xff] }
 0x1d3   : > { %1816 = vmatmul.bf16.gmra.mxu1 %v1494_v18  ;;  %v1435_v22 = vunpack.c.l.b16 %v1227_v20  ;;  %v1308_v63 = vsel %vm616_vm15, %v1290_v30, %v1291_v44  ;;  %1704 = vmatpush.bf16.msrb.mxu3 %v2483_v41 }
 0x1d4   : > { %v1180_v24 = vadd.f32 %v3506_v48, %v1149_v34  ;;  %v1354_v56 = vpack.c.bf16 %v1308_v63, %v1308_v63 }
 0x1d5   : > { %v1447_v10 = vpack.c.b16 %v1435_v22, %v1434_v14 }
 0x1d6   : > { %v1196_v46 = vmax.f32 %v1180_v24, 0.0  ;;  %v1482_v19 = vunpack.c.l.b16 %v1354_v56 }
 0x1d7   : > { %1772 = vmatmul.bf16.gmra.mxu0 %v1447_v10 }
 0x1d8   : > { %v3597_v42 = vsel %vm491_vm13, %v1196_v46, 0.0  ;;  %v1107_v46 = vadd.f32 %v1106_v7, %v3487_v47 }
 0x1d9   : > { %v1292_v26 = vrot.slane %v3597_v42, 1  ;;  %v1150_v17 = vpop.f32.mrf.mxu2  ;;  %v1228_v23 = vpack.c.bf16 %v3597_v42, %v3597_v42 }
 0x1da   : > { %v1151_v60 = vadd.f32 %v1150_v17, %v1102_v1  ;;  %v1109_v17 = vpop.f32.mrf.mxu3 }
 0x1db   : > { %v1307_v9 = vsel %vm616_vm15, %v1291_v44, %v1292_v26  ;;  %v1436_v22 = vunpack.c.l.b16 %v1228_v23  ;;  %v1110_v23 = vadd.f32 %v1109_v17, %v3492_v0 }
 0x1dc   : > { %v1181_v31 = vadd.f32 %v3506_v48, %v1151_v60  ;;  %v1323_v59 = vsel %vm402_vm8, 0.0, %v1307_v9  ;;  %v2482_v9 = vld [vmem:[#allocation7 + $0x10] sm:$0xff] }
 0x1dd   : > { %v1355_v27 = vpack.c.bf16 %v1323_v59, %v1323_v59  ;;  %1705 = vmatpush.bf16.msrb.mxu3 %v2482_v9 }
 0x1de   : > { %v1197_v33 = vmax.f32 %v1181_v31, 0.0 }
 0x1df   : > { %v1483_v30 = vunpack.c.l.b16 %v1355_v27 }
 0x1e0   : > { %v3612_v57 = vsel %vm492_vm5, %v1197_v33, 0.0 }
 0x1e1   : > { %v1153_v18 = vpop.f32.mrf.mxu2  ;;  %v1495_v20 = vpack.c.b16 %v1483_v30, %v1482_v19  ;;  %v1229_v34 = vpack.c.bf16 %v3612_v57, %v3612_v57  ;;  %v1293_v10 = vrot.slane %v3612_v57, 1 }
 0x1e2   : > { %v1154_v14 = vadd.f32 %v1153_v18, %v1105_v29 }
 0x1e3   : > { %1821 = vmatmul.bf16.gmra.mxu1 %v1495_v20  ;;  %v1437_v24 = vunpack.c.l.b16 %v1229_v34  ;;  %v1306_v63 = vsel %vm616_vm15, %v1292_v26, %v1293_v10  ;;  %v2481_v34 = vld [vmem:[#allocation7 + $0x8] sm:$0xff] }
 0x1e4   : > { %v1182_v44 = vadd.f32 %v3506_v48, %v1154_v14  ;;  %v1356_v59 = vpack.c.bf16 %v1306_v63, %v1306_v63  ;;  %1706 = vmatpush.bf16.msrb.mxu3 %v2481_v34 }
 0x1e5   : > { %v1448_v16 = vpack.c.b16 %v1437_v24, %v1436_v22  ;;  %v1111_v22 = vpop.f32.mrf.mxu3 }
 0x1e6   : > { %v1198_v53 = vmax.f32 %v1182_v44, 0.0  ;;  %v1484_v19 = vunpack.c.l.b16 %v1356_v59  ;;  %v1112_v63 = vadd.f32 %v1111_v22, %v3494_v25 }
 0x1e7   : > { %1777 = vmatmul.bf16.gmra.mxu0 %v1448_v16 }
 0x1e8   : > { %v3621_v1 = vsel %vm3957_vm2, %v1198_v53, 0.0  ;;  %vm3959_vm2 = vcmp.eq.s32.totalorder %v3066_v55, 1 }
 0x1e9   : > { %v1294_v38 = vrot.slane %v3621_v1, 1  ;;  %v1155_v60 = vpop.f32.mrf.mxu2  ;;  %v1230_v30 = vpack.c.bf16 %v3621_v1, %v3621_v1 }
 0x1ea   : > { %v1156_v56 = vadd.f32 %v1155_v60, %v1107_v46 }
 0x1eb   : > { %v1305_v31 = vsel %vm616_vm15, %v1293_v10, %v1294_v38  ;;  %v1438_v24 = vunpack.c.l.b16 %v1230_v30  ;;  %v2480_v10 = vld [vmem:[#allocation7] sm:$0xff] }
 0x1ec   : > { %v1183_v47 = vadd.f32 %v3506_v48, %v1156_v56  ;;  %v1325_v27 = vsel %vm402_vm8, 0.0, %v1305_v31  ;;  %1707 = vmatpush.bf16.msrb.mxu3 %v2480_v10 }
 0x1ed   : > { %v1357_v33 = vpack.c.bf16 %v1325_v27, %v1325_v27 }
 0x1ee   : > { %v1199_v7 = vmax.f32 %v1183_v47, 0.0 }
 0x1ef   : > { %v1485_v26 = vunpack.c.l.b16 %v1357_v33  ;;  %v1114_v33 = vpop.f32.mrf.mxu3 }
 0x1f0   : > { %v3636_v29 = vsel %vm3958_vm1, %v1199_v7, 0.0  ;;  %vm3960_vm1 = vcmp.eq.s32.totalorder %v3158_v37, 1 }
 0x1f1   : > { %v1158_v41 = vpop.f32.mrf.mxu2  ;;  %v1496_v18 = vpack.c.b16 %v1485_v26, %v1484_v19  ;;  %v1231_v20 = vpack.c.bf16 %v3636_v29, %v3636_v29  ;;  %v1295_v0 = vrot.slane %v3636_v29, 1 }
 0x1f2   : > { %v1159_v14 = vadd.f32 %v1158_v41, %v1110_v23  ;;  %v1115_v23 = vadd.f32 %v1114_v33, %v3499_v40  ;;  %v1236_v33 = vrot.slane %v3511_v49, 7 }
 0x1f3   : > { %1826 = vmatmul.bf16.gmra.mxu1 %v1496_v18  ;;  %v1439_v44 = vunpack.c.l.b16 %v1231_v20  ;;  %v1304_v60 = vsel %vm616_vm15, %v1294_v38, %v1295_v0 }
 0x1f4   : > { %v1184_v16 = vadd.f32 %v3506_v48, %v1159_v14  ;;  %v1358_v47 = vpack.c.bf16 %v1304_v60, %v1304_v60 }
 0x1f5   : > { %v1449_v53 = vpack.c.b16 %v1439_v44, %v1438_v24 }
 0x1f6   : > { %v1200_v46 = vmax.f32 %v1184_v16, 0.0  ;;  %v1486_v26 = vunpack.c.l.b16 %v1358_v47 }
 0x1f7   : > { %1782 = vmatmul.bf16.gmra.mxu0 %v1449_v53  ;;  %v1116_v40 = vpop.f32.mrf.mxu3 }
 0x1f8   : > { %v3645_v17 = vsel %vm3959_vm2, %v1200_v46, 0.0  ;;  %v1117_v53 = vadd.f32 %v1116_v40, %v3501_v28  ;;  %vm3961_vm2 = vcmp.eq.s32.totalorder %v3156_v36, 1 }
 0x1f9   : > { %v1296_v9 = vrot.slane %v3645_v17, 1  ;;  %v1160_v56 = vpop.f32.mrf.mxu2  ;;  %v1232_v38 = vpack.c.bf16 %v3645_v17, %v3645_v17 }
 0x1fa   : > { %v1161_v31 = vadd.f32 %v1160_v56, %v1112_v63 }
 0x1fb   : > { %v1303_v59 = vsel %vm616_vm15, %v1295_v0, %v1296_v9  ;;  %v1440_v22 = vunpack.c.l.b16 %v1232_v38 }
 0x1fc   : > { %v1185_v27 = vadd.f32 %v3506_v48, %v1161_v31  ;;  %v1327_v25 = vsel %vm402_vm8, 0.0, %v1303_v59  ;;  %v1237_v59 = vrot.slane %v3518_v21, 7 }
 0x1fd   : > { %v1359_v7 = vpack.c.bf16 %v1327_v25, %v1327_v25 }
 0x1fe   : > { %v1201_v19 = vmax.f32 %v1185_v27, 0.0  ;;  %v1266_v38 = vsel %vm563_vm4, %v1236_v33, %v1237_v59 }
 0x1ff   : > { %v1487_v30 = vunpack.c.l.b16 %v1359_v7 }
 0x200   : > { %v3660_v41 = vsel %vm3960_vm1, %v1201_v19, 0.0  ;;  %vm3962_vm1 = vcmp.eq.s32.totalorder %v3068_v58, 1 }
 0x201   : > { %v1163_v18 = vpop.f32.mrf.mxu2  ;;  %v1497_v20 = vpack.c.b16 %v1487_v30, %v1486_v26  ;;  %v1233_v34 = vpack.c.bf16 %v3660_v41, %v3660_v41  ;;  %v1297_v10 = vrot.slane %v3660_v41, 1 }
 0x202   : > { %v1164_v14 = vadd.f32 %v1163_v18, %v1115_v23 }
 0x203   : > { %1831 = vmatmul.bf16.gmra.mxu1 %v1497_v20  ;;  %v1441_v24 = vunpack.c.l.b16 %v1233_v34  ;;  %v1302_v63 = vsel %vm616_vm15, %v1296_v9, %v1297_v10 }
 0x204   : > { %v1186_v44 = vadd.f32 %v3506_v48, %v1164_v14  ;;  %v1360_v27 = vpack.c.bf16 %v1302_v63, %v1302_v63  ;;  %v1333_v14 = vpack.c.bf16 %v1266_v38, %v1266_v38 }
 0x205   : > { %v1450_v16 = vpack.c.b16 %v1441_v24, %v1440_v22 }
 0x206   : > { %v1202_v0 = vmax.f32 %v1186_v44, 0.0  ;;  %v1488_v9 = vunpack.c.l.b16 %v1360_v27 }
 0x207   : > { %1787 = vmatmul.bf16.gmra.mxu0 %v1450_v16 }
 0x208   : > { %v3669_v46 = vsel %vm3961_vm2, %v1202_v0, 0.0 }
 0x209   : > { %v1298_v60 = vrot.slane %v3669_v46, 1  ;;  %v1165_v56 = vpop.f32.mrf.mxu2  ;;  %v1234_v30 = vpack.c.bf16 %v3669_v46, %v3669_v46 }
 0x20a   : > { %v1166_v31 = vadd.f32 %v1165_v56, %v1117_v53 }
 0x20b   : > { %v1301_v47 = vsel %vm616_vm15, %v1297_v10, %v1298_v60  ;;  %v1442_v22 = vunpack.c.l.b16 %v1234_v30 }
 0x20c   : > { %v1187_v25 = vadd.f32 %v3506_v48, %v1166_v31  ;;  %v1329_v28 = vsel %vm402_vm8, 0.0, %v1301_v47  ;;  %v1381_v31 = vunpack.c.l.b16 %v1333_v14  ;;  %v1241_v14 = vrot.slane %v3565_v6, 7 }
 0x20d   : > { %v1361_v7 = vpack.c.bf16 %v1329_v28, %v1329_v28  ;;  %v1238_v28 = vrot.slane %v3527_v11, 7 }
 0x20e   : > { %v1203_v19 = vmax.f32 %v1187_v25, 0.0 }
 0x20f   : > { %v1489_v26 = vunpack.c.l.b16 %v1361_v7 }
 0x210   : > { %v3687_v23 = vsel %vm3962_vm1, %v1203_v19, 0.0  ;;  %v1265_v19 = vsel %vm563_vm4, %v1237_v59, %v1238_v28 }
 0x211   : > { %v1251_v48 = vrot.slane %v3687_v23, 7  ;;  %v1498_v18 = vpack.c.b16 %v1489_v26, %v1488_v9  ;;  %v1235_v20 = vpack.c.bf16 %v3687_v23, %v3687_v23  ;;  %v1299_v34 = vrot.slane %v3687_v23, 1 }
 0x213   : > { %1836 = vmatmul.bf16.gmra.mxu1 %v1498_v18  ;;  %v1443_v24 = vunpack.c.l.b16 %v1235_v20  ;;  %v1267_v44 = vsel %vm563_vm4, %v1251_v48, %v1236_v33  ;;  %v1315_v10 = vsel %vm616_vm15, %v1299_v34, %v1284_v32  ;;  %v1300_v53 = vsel %vm616_vm15, %v1298_v60, %v1299_v34 }
 0x214   : > { %v1268_v16 = vsel %vm399_vm7, 0.0, %v1267_v44  ;;  %v1331_v63 = vsel %vm402_vm8, 0.0, %v1315_v10  ;;  %v1362_v27 = vpack.c.bf16 %v1300_v53, %v1300_v53  ;;  %v1239_v32 = vrot.slane %v3543_v35, 7 }
 0x215   : > { %v1451_v0 = vpack.c.b16 %v1443_v24, %v1442_v22  ;;  %v1332_v40 = vpack.c.bf16 %v1268_v16, %v1268_v16  ;;  %v1363_v25 = vpack.c.bf16 %v1331_v63, %v1331_v63  ;;  %v1270_v60 = vsel %vm399_vm7, 0.0, %v1265_v19 }
 0x216   : > { %v1490_v33 = vunpack.c.l.b16 %v1362_v27  ;;  %v1264_v4 = vsel %vm563_vm4, %v1238_v28, %v1239_v32  ;;  %v1334_v30 = vpack.c.bf16 %v1270_v60, %v1270_v60  ;;  %v1240_v34 = vrot.slane %v3551_v54, 7 }
 0x217   : > { %1792 = vmatmul.bf16.gmra.mxu0 %v1451_v0  ;;  %v1380_v56 = vunpack.c.l.b16 %v1332_v40  ;;  %v1491_v7 = vunpack.c.l.b16 %v1363_v25  ;;  %v1335_v26 = vpack.c.bf16 %v1264_v4, %v1264_v4  ;;  %v1242_v53 = vrot.slane %v3573_v50, 7 }
 0x218   : > { %v1382_v18 = vunpack.c.l.b16 %v1334_v30  ;;  %v1263_v59 = vsel %vm563_vm4, %v1239_v32, %v1240_v34  ;;  %v1262_v22 = vsel %vm563_vm4, %v1240_v34, %v1241_v14  ;;  %v1243_v63 = vrot.slane %v3588_v39, 7 }
 0x219   : > { %v1396_v47 = vpack.c.b16 %v1381_v31, %v1380_v56  ;;  %v1499_v9 = vpack.c.b16 %v1491_v7, %v1490_v33  ;;  %v1383_v38 = vunpack.c.l.b16 %v1335_v26  ;;  %v1272_v24 = vsel %vm399_vm7, 0.0, %v1263_v59 }
 0x21a   : > { %v1337_v44 = vpack.c.bf16 %v1262_v22, %v1262_v22  ;;  %v1336_v10 = vpack.c.bf16 %v1272_v24, %v1272_v24  ;;  %v1261_v56 = vsel %vm563_vm4, %v1241_v14, %v1242_v53  ;;  %v1260_v31 = vsel %vm563_vm4, %v1242_v53, %v1243_v63 }
 0x21b   : > { %1708 = vmatmul.bf16.vlgmr.msrb.gmra.mxu3 %v1396_v47  ;;  %v1397_v20 = vpack.c.b16 %v1383_v38, %v1382_v18  ;;  %v1274_v47 = vsel %vm399_vm7, 0.0, %v1261_v56  ;;  %v1339_v27 = vpack.c.bf16 %v1260_v31, %v1260_v31  ;;  %v1244_v7 = vrot.slane %v3597_v42, 7 }
 0x21c   : > { %v1385_v16 = vunpack.c.l.b16 %v1337_v44  ;;  %v1384_v0 = vunpack.c.l.b16 %v1336_v10  ;;  %v1338_v25 = vpack.c.bf16 %v1274_v47, %v1274_v47  ;;  %v1245_v19 = vrot.slane %v3612_v57, 7 }
 0x21d   : > { %v1387_v28 = vunpack.c.l.b16 %v1339_v27  ;;  %v1259_v4 = vsel %vm563_vm4, %v1243_v63, %v1244_v7  ;;  %v1246_v34 = vrot.slane %v3621_v1, 7  ;;  %v1247_v14 = vrot.slane %v3636_v29, 7 }
 0x21e   : > { %v1398_v40 = vpack.c.b16 %v1385_v16, %v1384_v0  ;;  %v1386_v32 = vunpack.c.l.b16 %v1338_v25  ;;  %v1258_v60 = vsel %vm563_vm4, %v1244_v7, %v1245_v19  ;;  %v1248_v53 = vrot.slane %v3645_v17, 7 }
 0x21f   : > { %v1341_v26 = vpack.c.bf16 %v1258_v60, %v1258_v60  ;;  %v1257_v59 = vsel %vm563_vm4, %v1245_v19, %v1246_v34  ;;  %v1256_v22 = vsel %vm563_vm4, %v1246_v34, %v1247_v14  ;;  %v1249_v63 = vrot.slane %v3660_v41, 7 }
 0x220   : > { %v1399_v33 = vpack.c.b16 %v1387_v28, %v1386_v32  ;;  %v1278_v24 = vsel %vm399_vm7, 0.0, %v1257_v59  ;;  %v1343_v44 = vpack.c.bf16 %v1256_v22, %v1256_v22  ;;  %v1255_v56 = vsel %vm563_vm4, %v1247_v14, %v1248_v53 }
 0x221   : > { %v1389_v38 = vunpack.c.l.b16 %v1341_v26  ;;  %v1342_v10 = vpack.c.bf16 %v1278_v24, %v1278_v24  ;;  %v1254_v31 = vsel %vm563_vm4, %v1248_v53, %v1249_v63  ;;  %v1280_v47 = vsel %vm399_vm7, 0.0, %v1255_v56 }
 0x222   : > { %v1391_v16 = vunpack.c.l.b16 %v1343_v44  ;;  %v1345_v27 = vpack.c.bf16 %v1254_v31, %v1254_v31  ;;  %v1344_v25 = vpack.c.bf16 %v1280_v47, %v1280_v47  ;;  %v1250_v7 = vrot.slane %v3669_v46, 7 }
 0x223   : > { %1841 = vmatmul.bf16.gmra.mxu1 %v1499_v9  ;;  %v1276_v9 = vsel %vm399_vm7, 0.0, %v1259_v4  ;;  %v1390_v0 = vunpack.c.l.b16 %v1342_v10  ;;  %vm2046_vm15 = vcmask 1042434  }
 0x224   : > { %v1340_v30 = vpack.c.bf16 %v1276_v9, %v1276_v9  ;;  %v1393_v28 = vunpack.c.l.b16 %v1345_v27  ;;  %v1392_v32 = vunpack.c.l.b16 %v1344_v25  ;;  %v1253_v19 = vsel %vm563_vm4, %v1249_v63, %v1250_v7  ;;  %v1758_v60 = vpop.f32.mrf.mxu0 }
 0x225   : > { %v1252_v4 = vsel %vm563_vm4, %v1250_v7, %v1251_v48  ;;  %v1282_v9 = vsel %vm399_vm7, 0.0, %v1253_v19  ;;  %vm3967_vm4 = vmmov %vm3961_vm2 }
 0x226   : > { %v1388_v18 = vunpack.c.l.b16 %v1340_v30  ;;  %v1347_v26 = vpack.c.bf16 %v1252_v4, %v1252_v4  ;;  %vm3968_vm7 = vmmov %vm3962_vm1 }
 0x22b   : > { %1713 = vmatmul.bf16.gmra.mxu3 %v1397_v20  ;;  %v1400_v20 = vpack.c.b16 %v1389_v38, %v1388_v18  ;;  %v1346_v38 = vpack.c.bf16 %v1282_v9, %v1282_v9  ;;  %v1395_v18 = vunpack.c.l.b16 %v1347_v26 }
 0x22c   : > { %v1760_v14 = vpop.f32.mrf.mxu0 }
 0x230   : > { %v1807_v30 = vpop.f32.mrf.mxu1 }
 0x234   : > { %v1763_v22 = vpop.f32.mrf.mxu0 }
 0x238   : > { %v1809_v59 = vpop.f32.mrf.mxu1 }
 0x23b   : > { %1718 = vmatmul.bf16.gmra.mxu3 %v1398_v40  ;;  %v1401_v40 = vpack.c.b16 %v1391_v16, %v1390_v0 }
 0x23c   : > { %v1765_v44 = vpop.f32.mrf.mxu0 }
 0x240   : > { %v1812_v24 = vpop.f32.mrf.mxu1 }
 0x244   : > { %v1768_v56 = vpop.f32.mrf.mxu0 }
 0x248   : > { %v1814_v0 = vpop.f32.mrf.mxu1 }
 0x24b   : > { %1723 = vmatmul.bf16.gmra.mxu3 %v1399_v33  ;;  %v1402_v33 = vpack.c.b16 %v1393_v28, %v1392_v32 }
 0x24c   : > { %v1770_v26 = vpop.f32.mrf.mxu0 }
 0x250   : > { %v1817_v27 = vpop.f32.mrf.mxu1 }
 0x25b   : > { %1728 = vmatmul.bf16.gmra.mxu3 %v1400_v20  ;;  %v1394_v20 = vunpack.c.l.b16 %v1346_v38 }
 0x25d   : > { %v1403_v34 = vpack.c.b16 %v1395_v18, %v1394_v20  ;;  %v1819_v18 = vpop.f32.mrf.mxu1 }
 0x26b   : > { %1733 = vmatmul.bf16.gmra.mxu3 %v1401_v40 }
 0x27b   : > { %1738 = vmatmul.bf16.gmra.mxu3 %v1402_v33 }
 0x28b   : > { %1743 = vmatmul.bf16.gmra.mxu3 %v1403_v34 }
 0x29e   : > { %v1709_v10 = vpop.f32.mrf.mxu3 }
 0x29f   : > { %v1759_v16 = vadd.f32 %v1758_v60, %v1709_v10  ;;  %v1822_v10 = vpop.f32.mrf.mxu1 }
 0x2a1   : > { %v1808_v48 = vadd.f32 %v1807_v30, %v1759_v16 }
 0x2a3   : > { %v1851_v40 = vadd.f32 %v3767_v2, %v1808_v48 }
 0x2a5   : > { %v1867_v31 = vmax.f32 %v1851_v40, 0.0 }
 0x2a6   : > { %v1711_v53 = vpop.f32.mrf.mxu3 }
 0x2a7   : > { %v1761_v63 = vadd.f32 %v1760_v14, %v1711_v53  ;;  %v1883_v28 = vadd.f32 %v1867_v31, %v3511_v49  ;;  %v1773_v14 = vpop.f32.mrf.mxu0 }
 0x2a9   : > { %v1810_v47 = vadd.f32 %v1809_v59, %v1761_v63  ;;  %v1899_v4 = vsel %vm483_vm10, %v1883_v28, 0.0  ;;  %vm2043_vm10 = vcmask 1041409  }
 0x2ab   : > { %v1852_v25 = vadd.f32 %v3767_v2, %v1810_v47 }
 0x2ad   : > { %v1868_v32 = vmax.f32 %v1852_v25, 0.0 }
 0x2ae   : > { %v1714_v33 = vpop.f32.mrf.mxu3 }
 0x2af   : > { %v1884_v7 = vadd.f32 %v1868_v32, %v3518_v21  ;;  %v1764_v19 = vadd.f32 %v1763_v22, %v1714_v33  ;;  %v1775_v32 = vpop.f32.mrf.mxu0 }
 0x2b1   : > { %v1900_v60 = vsel %vm484_vm14, %v1884_v7, 0.0  ;;  %v1813_v9 = vadd.f32 %v1812_v24, %v1764_v19 }
 0x2b2   : > { %v2509_v30 = vpack.c.bf16 %v1900_v60, %v1899_v4  ;;  %v1950_v38 = vadd.f32 %v1900_v60, %v1899_v4 }
 0x2b3   : > { %v1853_v49 = vadd.f32 %v3767_v2, %v1813_v9 }
 0x2b4   : > { %2510 = vst [vmem:[%s3779_s11] sm:$0xff] %v2509_v30   ;;  %v1951_v59 = vrot.slane %v1950_v38, 4 }
 0x2b5   : > { %v1869_v34 = vmax.f32 %v1853_v49, 0.0 }
 0x2b6   : > { %v1716_v21 = vpop.f32.mrf.mxu3  ;;  %v1952_v53 = vadd.f32 %v1951_v59, %v1950_v38 }
 0x2b7   : > { %v1766_v20 = vadd.f32 %v1765_v44, %v1716_v21  ;;  %v1885_v22 = vadd.f32 %v1869_v34, %v3527_v11  ;;  %v1778_v59 = vpop.f32.mrf.mxu0 }
 0x2b8   : > { %v1953_v28 = vrot.slane %v1952_v53, 2 }
 0x2b9   : > { %v1815_v5 = vadd.f32 %v1814_v0, %v1766_v20  ;;  %v1901_v63 = vsel %vm485_vm0, %v1885_v22, 0.0  ;;  %v2011_v20 = vrot.slane %v3792_v52, 1 }
 0x2ba   : > { %v1954_v4 = vadd.f32 %v1953_v28, %v1952_v53 }
 0x2bb   : > { %v1854_v3 = vadd.f32 %v3767_v2, %v1815_v5 }
 0x2bc   : > { %v1955_v38 = vrot.slane %v1954_v4, 1 }
 0x2bd   : > { %v1870_v24 = vmax.f32 %v1854_v3, 0.0 }
 0x2be   : > { %v1719_v16 = vpop.f32.mrf.mxu3  ;;  %v1956_v22 = vadd.f32 %v1955_v38, %v1954_v4 }
 0x2bf   : > { %v1886_v48 = vadd.f32 %v1870_v24, %v3543_v35  ;;  %v1769_v40 = vadd.f32 %v1768_v56, %v1719_v16  ;;  %v1824_v56 = vpop.f32.mrf.mxu1 }
 0x2c1   : > { %v1902_v44 = vsel %vm486_vm11, %v1886_v48, 0.0  ;;  %v1818_v0 = vadd.f32 %v1817_v27, %v1769_v40 }
 0x2c2   : > { %v2514_v31 = vpack.c.bf16 %v1902_v44, %v1901_v63  ;;  %v1957_v47 = vadd.f32 %v1902_v44, %v1901_v63 }
 0x2c3   : > { %v1855_v11 = vadd.f32 %v3767_v2, %v1818_v0  ;;  %v2026_v0 = vmul.f32 %v3792_v52, %v1956_v22 }
 0x2c4   : > { %2546 = vst [vmem:[%s3779_s11 + $0x8] sm:$0xff] %v2514_v31   ;;  %v1958_v25 = vrot.slane %v1957_v47, 4 }
 0x2c5   : > { %v1871_v8 = vmax.f32 %v1855_v11, 0.0  ;;  %v1780_v11 = vpop.f32.mrf.mxu0 }
 0x2c6   : > { %v1959_v33 = vadd.f32 %v1958_v25, %v1957_v47  ;;  %v1721_v7 = vpop.f32.mrf.mxu3 }
 0x2c7   : > { %v1771_v35 = vadd.f32 %v1770_v26, %v1721_v7  ;;  %v1887_v49 = vadd.f32 %v1871_v8, %v3551_v54  ;;  %v1827_v54 = vpop.f32.mrf.mxu1  ;;  %v2012_v8 = vrot.slane %v3792_v52, 2 }
 0x2c8   : > { %v1960_v19 = vrot.slane %v1959_v33, 2 }
 0x2c9   : > { %v1820_v60 = vadd.f32 %v1819_v18, %v1771_v35  ;;  %v1903_v24 = vsel %vm487_vm9, %v1887_v49, 0.0 }
 0x2ca   : > { %v1961_v9 = vadd.f32 %v1960_v19, %v1959_v33 }
 0x2cb   : > { %v1856_v27 = vadd.f32 %v3767_v2, %v1820_v60 }
 0x2cc   : > { %v1962_v30 = vrot.slane %v1961_v9, 1 }
 0x2cd   : > { %v1872_v21 = vmax.f32 %v1856_v27, 0.0 }
 0x2ce   : > { %v1963_v34 = vadd.f32 %v1962_v30, %v1961_v9  ;;  %v1724_v26 = vpop.f32.mrf.mxu3 }
 0x2cf   : > { %v1888_v5 = vadd.f32 %v1872_v21, %v3565_v6  ;;  %v1774_v3 = vadd.f32 %v1773_v14, %v1724_v26  ;;  %v1829_v7 = vpop.f32.mrf.mxu1 }
 0x2d0   : > { %v2027_v18 = vmul.f32 %v2011_v20, %v1963_v34  ;;  %v1783_v34 = vpop.f32.mrf.mxu0 }
 0x2d1   : > { %v1904_v16 = vsel %vm488_vm3, %v1888_v5, 0.0  ;;  %v1823_v48 = vadd.f32 %v1822_v10, %v1774_v3 }
 0x2d2   : > { %v2519_v40 = vpack.c.bf16 %v1904_v16, %v1903_v24  ;;  %v1964_v53 = vadd.f32 %v1904_v16, %v1903_v24  ;;  %v2042_v63 = vrot.slane %v2027_v18, 7 }
 0x2d3   : > { %v1857_v6 = vadd.f32 %v3767_v2, %v1823_v48 }
 0x2d4   : > { %2547 = vst [vmem:[%s3779_s11 + $0x10] sm:$0xff] %v2519_v40   ;;  %v1965_v44 = vrot.slane %v1964_v53, 4  ;;  %v2044_v12 = vsel %vm2043_vm10, %v2042_v63, %v2026_v0 }
 0x2d5   : > { %v1873_v28 = vmax.f32 %v1857_v6, 0.0 }
 0x2d6   : > { %v1966_v14 = vadd.f32 %v1965_v44, %v1964_v53  ;;  %v1726_v31 = vpop.f32.mrf.mxu3 }
 0x2d7   : > { %v1776_v47 = vadd.f32 %v1775_v32, %v1726_v31  ;;  %v1889_v19 = vadd.f32 %v1873_v28, %v3573_v50  ;;  %v1832_v26 = vpop.f32.mrf.mxu1 }
 0x2d8   : > { %v1967_v25 = vrot.slane %v1966_v14, 2  ;;  %v1785_v24 = vpop.f32.mrf.mxu0 }
 0x2d9   : > { %v1825_v43 = vadd.f32 %v1824_v56, %v1776_v47  ;;  %v1905_v56 = vsel %vm489_vm12, %v1889_v19, 0.0  ;;  %vm3965_vm12 = vcmp.eq.s32.totalorder %v3066_v55, 1 }
 0x2da   : > { %v1968_v10 = vadd.f32 %v1967_v25, %v1966_v14 }
 0x2db   : > { %v1858_v33 = vadd.f32 %v3767_v2, %v1825_v43 }
 0x2dc   : > { %v1969_v35 = vrot.slane %v1968_v10, 1 }
 0x2dd   : > { %v1874_v4 = vmax.f32 %v1858_v33, 0.0 }
 0x2de   : > { %v1970_v60 = vadd.f32 %v1969_v35, %v1968_v10  ;;  %v1729_v9 = vpop.f32.mrf.mxu3 }
 0x2df   : > { %v1890_v32 = vadd.f32 %v1874_v4, %v3588_v39  ;;  %v1779_v27 = vadd.f32 %v1778_v59, %v1729_v9  ;;  %v1834_v40 = vpop.f32.mrf.mxu1 }
 0x2e0   : > { %v2028_v30 = vmul.f32 %v2012_v8, %v1970_v60  ;;  %v1788_v31 = vpop.f32.mrf.mxu0 }
 0x2e1   : > { %v1906_v38 = vsel %vm490_vm6, %v1890_v32, 0.0  ;;  %v1828_v49 = vadd.f32 %v1827_v54, %v1779_v27  ;;  %vm3964_vm6 = vcmp.eq.s32.totalorder %v3064_v51, 1 }
 0x2e2   : > { %v2524_v21 = vpack.c.bf16 %v1906_v38, %v1905_v56  ;;  %v2045_v20 = vrot.slane %v2028_v30, 6  ;;  %v1971_v30 = vadd.f32 %v1906_v38, %v1905_v56 }
 0x2e3   : > { %v1859_v50 = vadd.f32 %v3767_v2, %v1828_v49 }
 0x2e4   : > { %2548 = vst [vmem:[%s3779_s11 + $0x18] sm:$0xff] %v2524_v21   ;;  %v3815_v39 = vsel %vm2046_vm15, %v2045_v20, %v2044_v12 }
 0x2e5   : > { %v1875_v59 = vmax.f32 %v1859_v50, 0.0 }
 0x2e6   : > { %v1731_v5 = vpop.f32.mrf.mxu3 }
 0x2e7   : > { %v1781_v3 = vadd.f32 %v1780_v11, %v1731_v5  ;;  %v1891_v62 = vadd.f32 %v1875_v59, %v3597_v42  ;;  %v1972_v5 = vrot.slane %v1971_v30, 4 }
 0x2e8   : > { %v1790_v35 = vpop.f32.mrf.mxu0 }
 0x2e9   : > { %v1830_v45 = vadd.f32 %v1829_v7, %v1781_v3  ;;  %v1907_v53 = vsel %vm491_vm13, %v1891_v62, 0.0  ;;  %vm3966_vm13 = vcmp.eq.s32.totalorder %v3158_v37, 1  ;;  %v1973_v62 = vadd.f32 %v1972_v5, %v1971_v30 }
 0x2eb   : > { %v1860_v18 = vadd.f32 %v3767_v2, %v1830_v45  ;;  %v1974_v37 = vrot.slane %v1973_v62, 2 }
 0x2ed   : > { %v1876_v22 = vmax.f32 %v1860_v18, 0.0 }
 0x2ee   : > { %v1734_v16 = vpop.f32.mrf.mxu3 }
 0x2ef   : > { %v1892_v48 = vadd.f32 %v1876_v22, %v3612_v57  ;;  %v1784_v54 = vadd.f32 %v1783_v34, %v1734_v16  ;;  %v1837_v57 = vpop.f32.mrf.mxu1 }
 0x2f0   : > { %v1793_v27 = vpop.f32.mrf.mxu0 }
 0x2f1   : > { %v1908_v63 = vsel %vm492_vm5, %v1892_v48, 0.0  ;;  %v1833_v44 = vadd.f32 %v1832_v26, %v1784_v54  ;;  %vm3963_vm5 = vcmp.eq.s32.totalorder %v3114_v13, 1 }
 0x2f2   : > { %v2529_v0 = vpack.c.bf16 %v1908_v63, %v1907_v53  ;;  %v1978_v13 = vadd.f32 %v1908_v63, %v1907_v53 }
 0x2f3   : > { %v1861_v6 = vadd.f32 %v3767_v2, %v1833_v44 }
 0x2f4   : > { %2549 = vst [vmem:[%s3779_s11 + $0x20] sm:$0xff] %v2529_v0   ;;  %v1979_v3 = vrot.slane %v1978_v13, 4 }
 0x2f5   : > { %v1877_v47 = vmax.f32 %v1861_v6, 0.0 }
 0x2f6   : > { %v1736_v14 = vpop.f32.mrf.mxu3 }
 0x2f7   : > { %v1786_v42 = vadd.f32 %v1785_v24, %v1736_v14  ;;  %v1893_v15 = vadd.f32 %v1877_v47, %v3621_v1  ;;  %v1839_v4 = vpop.f32.mrf.mxu1  ;;  %v1980_v24 = vadd.f32 %v1979_v3, %v1978_v13 }
 0x2f8   : > { %v1795_v16 = vpop.f32.mrf.mxu0 }
 0x2f9   : > { %v1835_v12 = vadd.f32 %v1834_v40, %v1786_v42  ;;  %v1909_v10 = vsel %vm3963_vm5, %v1893_v15, 0.0  ;;  %v1981_v63 = vrot.slane %v1980_v24, 2 }
 0x2fb   : > { %v1862_v25 = vadd.f32 %v3767_v2, %v1835_v12  ;;  %v1982_v47 = vadd.f32 %v1981_v63, %v1980_v24 }
 0x2fd   : > { %v1878_v28 = vmax.f32 %v1862_v25, 0.0 }
 0x2fe   : > { %v1739_v43 = vpop.f32.mrf.mxu3 }
 0x2ff   : > { %v1894_v61 = vadd.f32 %v1878_v28, %v3636_v29  ;;  %v1789_v11 = vadd.f32 %v1788_v31, %v1739_v43  ;;  %v1842_v21 = vpop.f32.mrf.mxu1  ;;  %v1975_v31 = vadd.f32 %v1974_v37, %v1973_v62 }
 0x301   : > { %v1910_v33 = vsel %vm3964_vm6, %v1894_v61, 0.0  ;;  %v1838_v7 = vadd.f32 %v1837_v57, %v1789_v11  ;;  %v1976_v43 = vrot.slane %v1975_v31, 1  ;;  %v1983_v61 = vrot.slane %v1982_v47, 1 }
 0x302   : > { %v2534_v19 = vpack.c.bf16 %v1910_v33, %v1909_v10  ;;  %v1985_v20 = vadd.f32 %v1910_v33, %v1909_v10 }
 0x303   : > { %v1863_v8 = vadd.f32 %v3767_v2, %v1838_v7 }
 0x304   : > { %2550 = vst [vmem:[%s3779_s11 + $0x28] sm:$0xff] %v2534_v19   ;;  %v1986_v38 = vrot.slane %v1985_v20, 4 }
 0x305   : > { %v1879_v9 = vmax.f32 %v1863_v8, 0.0 }
 0x306   : > { %v1741_v60 = vpop.f32.mrf.mxu3  ;;  %v1987_v48 = vadd.f32 %v1986_v38, %v1985_v20 }
 0x307   : > { %v1791_v1 = vadd.f32 %v1790_v35, %v1741_v60  ;;  %v1895_v49 = vadd.f32 %v1879_v9, %v3645_v17  ;;  %v1844_v53 = vpop.f32.mrf.mxu1  ;;  %v1977_v35 = vadd.f32 %v1976_v43, %v1975_v31 }
 0x308   : > { %v1988_v6 = vrot.slane %v1987_v48, 2 }
 0x309   : > { %v1840_v32 = vadd.f32 %v1839_v4, %v1791_v1  ;;  %v1911_v59 = vsel %vm3965_vm12, %v1895_v49, 0.0 }
 0x30a   : > { %v1989_v25 = vadd.f32 %v1988_v6, %v1987_v48 }
 0x30b   : > { %v1864_v29 = vadd.f32 %v3767_v2, %v1840_v32 }
 0x30d   : > { %v1880_v51 = vmax.f32 %v1864_v29, 0.0 }
 0x30e   : > { %v1744_v34 = vpop.f32.mrf.mxu3 }
 0x30f   : > { %v1896_v50 = vadd.f32 %v1880_v51, %v3660_v41  ;;  %v1794_v26 = vadd.f32 %v1793_v27, %v1744_v34 }
 0x311   : > { %v1912_v45 = vsel %vm3966_vm13, %v1896_v50, 0.0  ;;  %v1843_v56 = vadd.f32 %v1842_v21, %v1794_v26 }
 0x312   : > { %v2539_v17 = vpack.c.bf16 %v1912_v45, %v1911_v59  ;;  %v1992_v18 = vadd.f32 %v1912_v45, %v1911_v59 }
 0x313   : > { %v1865_v41 = vadd.f32 %v3767_v2, %v1843_v56 }
 0x314   : > { %2551 = vst [vmem:[%s3779_s11 + $0x30] sm:$0xff] %v2539_v17   ;;  %v1993_v22 = vrot.slane %v1992_v18, 4 }
 0x315   : > { %v1881_v44 = vmax.f32 %v1865_v41, 0.0 }
 0x316   : > { %v1746_v54 = vpop.f32.mrf.mxu3  ;;  %v1994_v40 = vadd.f32 %v1993_v22, %v1992_v18 }
 0x317   : > { %v1796_v55 = vadd.f32 %v1795_v16, %v1746_v54  ;;  %v1897_v12 = vadd.f32 %v1881_v44, %v3669_v46  ;;  %v1990_v46 = vrot.slane %v1989_v25, 1 }
 0x318   : > { %v1995_v14 = vrot.slane %v1994_v40, 2 }
 0x319   : > { %v1845_v0 = vadd.f32 %v1844_v53, %v1796_v55 }
 0x31a   : > { %v1996_v15 = vadd.f32 %v1995_v14, %v1994_v40 }
 0x31b   : > { %v1866_v42 = vadd.f32 %v3767_v2, %v1845_v0  ;;  %v1913_v2 = vsel %vm3967_vm4, %v1897_v12, 0.0 }
 0x31c   : > { %v1997_v7 = vrot.slane %v1996_v15, 1 }
 0x31d   : > { %v1882_v57 = vmax.f32 %v1866_v42, 0.0 }
 0x31f   : > { %v1898_v28 = vadd.f32 %v1882_v57, %v3687_v23  ;;  %v1984_v23 = vadd.f32 %v1983_v61, %v1982_v47 }
 0x321   : > { %v1914_v11 = vsel %vm3968_vm7, %v1898_v28, 0.0 }
 0x322   : > { %v2544_v10 = vpack.c.bf16 %v1914_v11, %v1913_v2  ;;  %v1999_v33 = vadd.f32 %v1914_v11, %v1913_v2 }
 0x324   : > { %2552 = vst [vmem:[%s3779_s11 + $0x38] sm:$0xff] %v2544_v10   ;;  %v2000_v19 = vrot.slane %v1999_v33, 4 }
 0x325   : > { %2770 = shalt.err (!%p2767_p12)
}
 0x326   : > { %s2852_s11 = smov 64   ;;  %s2853_s2 = smov 4   ;;  %v2013_v58 = vrot.slane %v3792_v52, 3  ;;  %v1991_v36 = vadd.f32 %v1990_v46, %v1989_v25  ;;  %v2001_v4 = vadd.f32 %v2000_v19, %v1999_v33  ;;  %v2014_v8 = vrot.slane %v3792_v52, 4 }
 0x327   : > { %2579 = dma.vmem_to_hbm [thread:$0]  (%p2966_p3), %s3856_s12, 1024, %s2087_s30, %s2066_s18, %s2852_s11, %s2852_s11, %s2853_s2   ;;  %v1998_v60 = vadd.f32 %v1997_v7, %v1996_v15  ;;  %v2015_v1 = vrot.slane %v3792_v52, 5  ;;  %v2016_v29 = vrot.slane %v3792_v52, 6  ;;  %vm2049_vm14 = vcmask 1043459  }
 0x328   : > { %v2029_v9 = vmul.f32 %v2013_v58, %v1977_v35  ;;  %v2002_v32 = vrot.slane %v2001_v4, 2  ;;  %v2030_v27 = vmul.f32 %v2014_v8, %v1984_v23  ;;  %s2252_s19 = sshll.u32 %s2999_s14, 3  ;;  %s2451_s13 = sshll.u32 %s2915_s28, 3  ;;  %v2017_v50 = vrot.slane %v3792_v52, 7 }
 0x329   : > { %v2031_v13 = vmul.f32 %v2015_v1, %v1991_v36  ;;  %v2032_v49 = vmul.f32 %v2016_v29, %v1998_v60  ;;  %s2099_s18 = scalar_lea.hbm %s3918_s7, %s2451_s13  ;;  %vm2052_vm0 = vcmask 1044484   ;;  %vm2055_vm9 = vcmask 1045509   ;;  %s356_s28 = scalar_lea.vmem [#allocation9], %s2252_s19 }
 0x32a   : > { %v2003_v30 = vadd.f32 %v2002_v32, %v2001_v4  ;;  %v2048_v51 = vrot.slane %v2029_v9, 5  ;;  %v2051_v20 = vrot.slane %v2030_v27, 4  ;;  %vm2058_vm11 = vcmask 1046534   ;;  %s2101_s21 = sshll.u32 %s356_s28, 4  ;;  %s2103_s29 = sshll.u32 %s2099_s18, 4  ;;  %s2102_s21 = int_to_ptr.vmem [resolvable:$true] %s2101_s21  ;;  %s2104_s29 = int_to_ptr.hbm [resolvable:$true] %s2103_s29 }
 0x32b   : > { %v2054_v26 = vrot.slane %v2031_v13, 3  ;;  %v2057_v5 = vrot.slane %v2032_v49, 2  ;;  %vm2061_vm3 = vcmask 1047559   ;;  %s2071_s23 = scalar_lea.sflag [#allocation10], %s2999_s14  ;;  %s2785_s15 = sshra.s32 %s2104_s29, 4  ;;  %s2786_s15 = int_to_ptr.hbm [resolvable:$true] %s2785_s15 }
 0x32c   : > { %v2004_v21 = vrot.slane %v2003_v30, 1  ;;  %v2050_v59 = vsel %vm2049_vm14, %v2048_v51, %v3815_v39  ;;  %s2787_s16 = scalar_lea.hbm %s2786_s15, 8  ;;  %s2791_s11 = scalar_lea.hbm %s3918_s7, 16 }
 0x32d   : > { %v2053_v45 = vsel %vm2052_vm0, %v2051_v20, %v2050_v59  ;;  %p2788_p13 = scmp.ne.s32.totalorder %s2786_s15, %s2787_s16  ;;  %p2792_p7 = scmp.lt.s32.totalorder %s2786_s15, %s3918_s7 }
 0x32e   : > { %v2005_v34 = vadd.f32 %v2004_v21, %v2003_v30  ;;  %v2056_v56 = vsel %vm2055_vm9, %v2054_v26, %v2053_v45  ;;  %p2793_p8 = scmp.lt.s32.totalorder %s2791_s11, %s2787_s16 }
 0x32f   : > { %v2059_v17 = vsel %vm2058_vm11, %v2057_v5, %v2056_v56  ;;  %p2789_p0 = pnand %p2788_p13, %p2966_p3 }
 0x330   : > { %v2033_v3 = vmul.f32 %v2017_v50, %v2005_v34  ;;  %p2794_p1 = por %p2793_p8, %p2792_p7 }
 0x331   : > { %p2790_p5 = pneg %p2789_p0 }
 0x332   : > { %v2060_v38 = vrot.slane %v2033_v3, 1 }
 0x333   : > { %p2795_p4 = pnand %p2794_p1, %p2790_p5 }
 0x334   : > { %v2062_v52 = vsel %vm2061_vm3, %v2060_v38, %v2059_v17 }
 0x335   : > { %2064 = vst [vmem:[%s356_s28] sm:$0xff] %v2062_v52 }
 0x336   : > { %2798 = shalt.err (!%p2795_p4)
}
 0x337   : > { %2580 = dma.vmem_to_hbm [thread:$0]  (%p2966_p3), %s2102_s21, 128, %s2104_s29, %s2071_s23  }
 0x338 PF: > { %s2115_s14 = sand.u32 1, %s2833_s24   ;;  %p3969_p11 = scmp.ge.s32.totalorder %s2845_s27, 2 }
 0x339   : > { %s2116_s13 = scalar_lea.sflag [#allocation4], %s2115_s14 }
 0x33a   : > { %p2595_p2 = pnand %p3969_p11, %p2929_p6 }
 0x33c   : > { %p2596_p9 = pneg %p2595_p2 }
 0x33e   : > { %2824 = dma.done.wait (%p2596_p9), %s2116_s13, 1024  }
 0x33f   : > { %2826 = vsyncadd (%p2596_p9), %s2116_s13, 4294966272  ;;  %s2126_s12 = scalar_lea.sflag [#allocation10], %s2115_s14 }
 0x340   : > { %2828 = dma.done.wait (%p2596_p9), %s2126_s12, 128  }
 0x341   : > { %2830 = vsyncadd (%p2596_p9), %s2126_s12, 4294967168  ;;  %p25_p3 = scmp.ge.s32.totalorder %s2956_s22, 4   ;;  %s3970_s24 = smov %s2837_s25 }
 0x342   : > { %s3971_s25 = smov %s2841_s26  ;;  %s3972_s26 = smov %s2972_s10 }
 0x343   : > { %s3973_s27 = smov %s2956_s22  ;;  %27 = sbr.rel (!%p25_p3) target bundleno = 10 (0xa), region = 117 }
 0x348   :  { %2132 = vsyncpa [#allocation3], 1 }
 0x349   :  { %2134 = vsyncpa [#allocation3 + $0x1], 1 }
 0x34a   :  { %2135 = vsyncpa [#allocation6], 1 }
 0x34b   :  { %2136 = vsyncpa [#allocation4], 1 }
 0x34c   :  { %2138 = vsyncpa [#allocation4 + $0x1], 1 }
 0x34d   :  { %2139 = vsyncpa [#allocation10], 1 }
 0x34e   :  { %2141 = vsyncpa [#allocation10 + $0x1], 1 }

</bundles_post_ra>
